<compile_context>
chip_gen: v7x
topology: tpu7x:2x2x1
jax: 0.10.0
libtpu: 0.0.40
codegen_flags: <defaults>
</compile_context>

<pallas_src>
import functools

import jax
import jax.numpy as jnp
from jax.experimental import pallas as pl
from jax.experimental.pallas import tpu as pltpu


def _round_up(n, m):
    return (n + m - 1) // m * m


def relation_kernel(x_ref, wf_ref, bf_ref, w1_ref, b1_ref, w2_ref, b2_ref,
                    out_ref, acc_ref, *, n_support_pad):
    k = pl.program_id(1)

    # ---- backbone stand-in, K-tiled: acc += x_tile @ wf_tile (f32 acc) ----
    @pl.when(k == 0)
    def _():
        acc_ref[...] = jnp.zeros_like(acc_ref)

    acc_ref[...] += jnp.dot(x_ref[...], wf_ref[...],
                            preferred_element_type=jnp.float32)

    # ---- relation head: once per episode, on the last K step ----
    @pl.when(k == pl.num_programs(1) - 1)
    def _():
        feat = acc_ref[...] + bf_ref[...]                       # [M_pad, 512] f32
        fd = wf_ref.shape[1]                                    # 512

        # Split on an 8-row (sublane) boundary; cast to bf16 for MXU rate,
        # f32 accumulation via preferred_element_type.
        sup = feat[:n_support_pad].astype(jnp.bfloat16)         # [S_pad, 512]
        qry = feat[n_support_pad:].astype(jnp.bfloat16)         # [B_pad, 512]

        # cat(support, query) @ W1  ==  sup @ W1[:512] + qry @ W1[512:]
        # (static ref slices of w1_ref are free); b1 folded into the sup half.
        h_sup = jnp.dot(sup, w1_ref[:fd, :],
                        preferred_element_type=jnp.float32) + b1_ref[...]   # [S_pad, 256]
        h_qry = jnp.dot(qry, w1_ref[fd:, :],
                        preferred_element_type=jnp.float32)                 # [B_pad, 256]

        # pairwise relation tensor + ReLU (small: B_pad*S_pad*256 f32 = 64 KiB)
        hidden = jnp.maximum(h_qry[:, None, :] + h_sup[None, :, :], 0.0)    # [B_pad, S_pad, 256]

        # final Linear(256, 1) as VPU multiply + lane reduction (no N=1 MXU pass)
        scores = jnp.sum(hidden * w2_ref[...][None, :, :], axis=-1)         # [B_pad, S_pad]
        out_ref[...] = scores + b2_ref[...]


def relation_network_forward_episodes(support, query, params, *, k_tile=256):
    """Batched episodes.

    support: [E, S, ...image dims...], query: [E, B, ...image dims...].
    Returns scores [E, B, S].
    """
    w_feat, b_feat, w1, b1, w2, b2 = params
    E, S = support.shape[:2]
    B = query.shape[1]
    feat_dim = w_feat.shape[1]          # 512
    hidden = w1.shape[1]                # 256
    assert w2.shape[-1] == 1, "kernel epilogue is specialized to n_way == 1"

    sup = support.reshape(E, S, -1)
    qry = query.reshape(E, B, -1)
    in_dim = sup.shape[-1]
    assert w_feat.shape[0] == in_dim

    # Row padding to sublane multiples; K padding to the lane-aligned tile.
    # NOTE: k_tile here is sized for toy in_dim; at ResNet-scale in_dim raise
    # it per generation (v7x: keep wf tile <= ~8 MiB bf16; v6e/v5e can take
    # 2-4x larger tiles with vmem_limit_bytes raised).
    S_pad = _round_up(S, 8)
    B_pad = _round_up(B, 8)
    M_pad = S_pad + B_pad
    k_tile = _round_up(k_tile, 128)
    k_tile = min(k_tile, _round_up(in_dim, 128))
    K_pad = _round_up(in_dim, k_tile)
    n_k = K_pad // k_tile

    sup_p = jnp.pad(sup, ((0, 0), (0, S_pad - S), (0, K_pad - in_dim)))
    qry_p = jnp.pad(qry, ((0, 0), (0, B_pad - B), (0, K_pad - in_dim)))
    x = jnp.concatenate([sup_p, qry_p], axis=1).astype(jnp.bfloat16)   # [E, M_pad, K_pad]

    wf = jnp.pad(w_feat, ((0, K_pad - in_dim), (0, 0))).astype(jnp.bfloat16)  # [K_pad, 512]
    bf = b_feat.reshape(1, feat_dim).astype(jnp.float32)
    w1b = w1.astype(jnp.bfloat16)                                       # [1024, 256]
    b1r = b1.reshape(1, hidden).astype(jnp.float32)
    w2r = w2.reshape(1, hidden).astype(jnp.float32)
    b2r = b2.reshape(1, 1).astype(jnp.float32)

    flops = int(2 * E * M_pad * K_pad * feat_dim
                + 2 * E * M_pad * feat_dim * hidden
                + 4 * E * B_pad * S_pad * hidden)
    bytes_accessed = int(E * M_pad * K_pad * 2            # x
                         + E * K_pad * feat_dim * 2       # wf (re-read per episode)
                         + E * 2 * feat_dim * hidden * 2  # w1
                         + E * B_pad * S_pad * 4)         # out

    grid_spec = pltpu.PrefetchScalarGridSpec(
        num_scalar_prefetch=0,
        grid=(E, n_k),
        in_specs=[
            pl.BlockSpec((None, M_pad, k_tile), lambda e, k: (e, 0, k)),   # x tile
            pl.BlockSpec((k_tile, feat_dim), lambda e, k: (k, 0)),         # wf tile
            pl.BlockSpec((1, feat_dim), lambda e, k: (0, 0)),              # bf
            pl.BlockSpec((2 * feat_dim, hidden), lambda e, k: (0, 0)),     # w1
            pl.BlockSpec((1, hidden), lambda e, k: (0, 0)),                # b1
            pl.BlockSpec((1, hidden), lambda e, k: (0, 0)),                # w2
            pl.BlockSpec((1, 1), lambda e, k: (0, 0)),                     # b2
        ],
        out_specs=pl.BlockSpec((None, B_pad, S_pad), lambda e, k: (e, 0, 0)),
        scratch_shapes=[pltpu.VMEM((M_pad, feat_dim), jnp.float32)],
    )

    scores_pad = pl.pallas_call(
        functools.partial(relation_kernel, n_support_pad=S_pad),
        out_shape=jax.ShapeDtypeStruct((E, B_pad, S_pad), jnp.float32),
        grid_spec=grid_spec,
        compiler_params=pltpu.CompilerParams(
            # episode axis shards across TensorCores (v7x megacore);
            # K is the reduction axis carried by the accumulator scratch.
            dimension_semantics=("parallel", "arbitrary")),
        cost_estimate=pl.CostEstimate(flops=flops, transcendentals=0,
                                      bytes_accessed=bytes_accessed),
    )(x, wf, bf, w1b, b1r, w2r, b2r)

    return scores_pad[:, :B, :S]


def relation_network_forward(support, query, params):
    """Single episode (matches the PyTorch module's forward).

    support: [S, 3, H, W], query: [B, 3, H, W] (NCHW, float32) -> [B, S]."""
    return relation_network_forward_episodes(support[None], query[None], params)[0]


def make_params(key, in_dim, feat_dim=512, hidden=256, n_way=1):
    k = jax.random.split(key, 6)
    scale = 0.02
    w_feat = scale * jax.random.normal(k[0], (in_dim, feat_dim), jnp.float32)
    b_feat = scale * jax.random.normal(k[1], (feat_dim,), jnp.float32)
    w1 = scale * jax.random.normal(k[2], (2 * feat_dim, hidden), jnp.float32)
    b1 = scale * jax.random.normal(k[3], (hidden,), jnp.float32)
    w2 = scale * jax.random.normal(k[4], (hidden, n_way), jnp.float32)
    b2 = scale * jax.random.normal(k[5], (n_way,), jnp.float32)
    return (w_feat, b_feat, w1, b1, w2, b2)


def reference_forward(support, query, params):
    """Plain-JAX mirror of the PyTorch module, applying the same bf16 rounding
    the kernel applies at its boundaries (weights / images / features); all
    math in f32."""
    w_feat, b_feat, w1, b1, w2, b2 = params
    S, B = support.shape[0], query.shape[0]
    rb = lambda a: a.astype(jnp.bfloat16).astype(jnp.float32)
    with jax.default_matmul_precision("float32"):
        sup_feat = rb(rb(support.reshape(S, -1)) @ rb(w_feat) + b_feat)   # backbone stand-in
        qry_feat = rb(rb(query.reshape(B, -1)) @ rb(w_feat) + b_feat)
        sup_e = jnp.broadcast_to(sup_feat[None, :, :], (B, S, sup_feat.shape[1]))
        qry_e = jnp.broadcast_to(qry_feat[:, None, :], (B, S, qry_feat.shape[1]))
        relations = jnp.concatenate([sup_e, qry_e], axis=-1)              # [B, S, 1024]
        h = jnp.maximum(relations @ rb(w1) + b1, 0.0)
        out = h @ w2 + b2                                                 # [B, S, 1]
    return out.reshape(B, S)


if __name__ == "__main__":
    key = jax.random.PRNGKey(0)
    k_sup, k_qry, k_par, k_bsup, k_bqry = jax.random.split(key, 5)

    # small, module-consistent shapes: NCHW images, 4-way support set, 2 queries
    support = jax.random.normal(k_sup, (4, 3, 16, 16), jnp.float32)
    query = jax.random.normal(k_qry, (2, 3, 16, 16), jnp.float32)

    in_dim = 3 * 16 * 16
    params = make_params(k_par, in_dim, feat_dim=512, hidden=256, n_way=1)

    # --- single-episode path (module semantics) ---
    scores = relation_network_forward(support, query, params)
    scores = jax.block_until_ready(scores)
    ref = reference_forward(support, query, params)
    assert scores.shape == (2, 4)
    assert jnp.allclose(scores, ref, atol=2e-3, rtol=2e-3), (scores, ref)

    # --- batched-episode path (amortizes weight DMA, fills the grid) ---
    sup_b = jax.random.normal(k_bsup, (3, 4, 3, 16, 16), jnp.float32)
    qry_b = jax.random.normal(k_bqry, (3, 2, 3, 16, 16), jnp.float32)
    scores_b = relation_network_forward_episodes(sup_b, qry_b, params)
    scores_b = jax.block_until_ready(scores_b)
    ref_b = jnp.stack([reference_forward(sup_b[e], qry_b[e], params)
                       for e in range(3)])
    assert scores_b.shape == (3, 2, 4)
    assert jnp.allclose(scores_b, ref_b, atol=2e-3, rtol=2e-3), (scores_b, ref_b)

    print("KERNEL_OK")
</pallas_src>

<mosaic_0001>
module attributes {stable_mosaic.version = 11 : i64} {
  func.func @relation_kernel(%arg0: i32, %arg1: i32, %arg2: memref<1x16x256xbf16, #tpu.memory_space<vmem>>, %arg3: memref<256x512xbf16, #tpu.memory_space<vmem>>, %arg4: memref<1x512xf32, #tpu.memory_space<vmem>>, %arg5: memref<1024x256xbf16, #tpu.memory_space<vmem>>, %arg6: memref<1x256xf32, #tpu.memory_space<vmem>>, %arg7: memref<1x256xf32, #tpu.memory_space<vmem>>, %arg8: memref<1x1xf32, #tpu.memory_space<vmem>>, %arg9: memref<1x8x8xf32, #tpu.memory_space<vmem>>, %arg10: memref<16x512xf32, #tpu.memory_space<vmem>>) attributes {dimension_semantics = [#tpu.dimension_semantics<parallel>, #tpu.dimension_semantics<arbitrary>], iteration_bounds = array<i64: 1, 3>, scalar_prefetch = 0 : i64, scratch_operands = 1 : i64, tpu.core_type = #tpu.core_type<tc>, window_params = [{transform_indices = @transform_0, window_bounds = array<i64: 1, 16, 256>}, {transform_indices = @transform_1, window_bounds = array<i64: 256, 512>}, {pipeline_mode = #tpu.pipeline_mode<synchronous>, transform_indices = @transform_2, window_bounds = array<i64: 1, 512>}, {pipeline_mode = #tpu.pipeline_mode<synchronous>, transform_indices = @transform_3, window_bounds = array<i64: 1024, 256>}, {pipeline_mode = #tpu.pipeline_mode<synchronous>, transform_indices = @transform_4, window_bounds = array<i64: 1, 256>}, {pipeline_mode = #tpu.pipeline_mode<synchronous>, transform_indices = @transform_5, window_bounds = array<i64: 1, 256>}, {pipeline_mode = #tpu.pipeline_mode<synchronous>, transform_indices = @transform_6, window_bounds = array<i64: 1, 1>}, {transform_indices = @transform_7, window_bounds = array<i64: 1, 8, 8>}]} {
    %c0_i32 = arith.constant 0 : i32
    %0 = arith.cmpi eq, %arg1, %c0_i32 : i32
    %1 = arith.extui %0 : i1 to i32
    %c0_i32_0 = arith.constant 0 : i32
    %2 = arith.cmpi ne, %1, %c0_i32_0 : i32
    scf.if %2 {
      %cst_10 = arith.constant 0.000000e+00 : f32
      %13 = vector.broadcast %cst_10 : f32 to vector<16x512xf32>
      %c0_11 = arith.constant 0 : index
      %c0_12 = arith.constant 0 : index
      %14 = vector.load %arg10[%c0_11, %c0_12] : memref<16x512xf32, #tpu.memory_space<vmem>>, vector<16x512xf32>
      tpu.vector_store %arg10[%c0_11, %c0_12], %13 {strides = array<i32>} : memref<16x512xf32, #tpu.memory_space<vmem>>, vector<16x512xf32>,
    } else {
    }
    %c0 = arith.constant 0 : index
    %c0_1 = arith.constant 0 : index
    %3 = vector.load %arg10[%c0, %c0_1] : memref<16x512xf32, #tpu.memory_space<vmem>>, vector<16x512xf32>
    %c0_2 = arith.constant 0 : index
    %c0_3 = arith.constant 0 : index
    %c0_4 = arith.constant 0 : index
    %4 = vector.load %arg2[%c0_2, %c0_3, %c0_4] : memref<1x16x256xbf16, #tpu.memory_space<vmem>>, vector<1x16x256xbf16>
    %5 = vector.shape_cast %4 : vector<1x16x256xbf16> to vector<16x256xbf16>
    %c0_5 = arith.constant 0 : index
    %c0_6 = arith.constant 0 : index
    %6 = vector.load %arg3[%c0_5, %c0_6] : memref<256x512xbf16, #tpu.memory_space<vmem>>, vector<256x512xbf16>
    %cst = arith.constant dense<0.000000e+00> : vector<16x512xf32>
    %7 = tpu.matmul %5, %6, %cst {dimension_numbers = #tpu.dot_dimension_numbers<[1], [0], [0], [1], [0, 0, 1, 1], [], []>} : vector<16x256xbf16>, vector<256x512xbf16>, vector<16x512xf32> -> vector<16x512xf32>
    %8 = arith.addf %3, %7 : vector<16x512xf32>
    %c0_7 = arith.constant 0 : index
    %c0_8 = arith.constant 0 : index
    %9 = vector.load %arg10[%c0_7, %c0_8] : memref<16x512xf32, #tpu.memory_space<vmem>>, vector<16x512xf32>
    tpu.vector_store %arg10[%c0_7, %c0_8], %8 {strides = array<i32>} : memref<16x512xf32, #tpu.memory_space<vmem>>, vector<16x512xf32>,
    %c2_i32 = arith.constant 2 : i32
    %10 = arith.cmpi eq, %arg1, %c2_i32 : i32
    %11 = arith.extui %10 : i1 to i32
    %c0_i32_9 = arith.constant 0 : i32
    %12 = arith.cmpi ne, %11, %c0_i32_9 : i32
    scf.if %12 {
      %c0_10 = arith.constant 0 : index
      %c0_11 = arith.constant 0 : index
      %13 = vector.load %arg10[%c0_10, %c0_11] : memref<16x512xf32, #tpu.memory_space<vmem>>, vector<16x512xf32>
      %c0_12 = arith.constant 0 : index
      %c0_13 = arith.constant 0 : index
      %14 = vector.load %arg4[%c0_12, %c0_13] : memref<1x512xf32, #tpu.memory_space<vmem>>, vector<1x512xf32>
      %15 = vector.broadcast %14 : vector<1x512xf32> to vector<16x512xf32>
      %16 = arith.addf %13, %15 : vector<16x512xf32>
      %17 = vector.extract_strided_slice %16 {offsets = [0, 0], sizes = [8, 512], strides = [1, 1]} : vector<16x512xf32> to vector<8x512xf32>
      %18 = arith.truncf %17 : vector<8x512xf32> to vector<8x512xbf16>
      %19 = vector.extract_strided_slice %16 {offsets = [8, 0], sizes = [8, 512], strides = [1, 1]} : vector<16x512xf32> to vector<8x512xf32>
      %20 = arith.truncf %19 : vector<8x512xf32> to vector<8x512xbf16>
      %c0_14 = arith.constant 0 : index
      %c0_15 = arith.constant 0 : index
      %21 = vector.load %arg5[%c0_14, %c0_15] : memref<1024x256xbf16, #tpu.memory_space<vmem>>, vector<512x256xbf16>
      %cst_16 = arith.constant dense<0.000000e+00> : vector<8x256xf32>
      %22 = tpu.matmul %18, %21, %cst_16 {dimension_numbers = #tpu.dot_dimension_numbers<[1], [0], [0], [1], [0, 0, 1, 1], [], []>} : vector<8x512xbf16>, vector<512x256xbf16>, vector<8x256xf32> -> vector<8x256xf32>
      %c0_17 = arith.constant 0 : index
      %c0_18 = arith.constant 0 : index
      %23 = vector.load %arg6[%c0_17, %c0_18] : memref<1x256xf32, #tpu.memory_space<vmem>>, vector<1x256xf32>
      %24 = vector.broadcast %23 : vector<1x256xf32> to vector<8x256xf32>
      %25 = arith.addf %22, %24 : vector<8x256xf32>
      %c512 = arith.constant 512 : index
      %c0_19 = arith.constant 0 : index
      %26 = vector.load %arg5[%c512, %c0_19] : memref<1024x256xbf16, #tpu.memory_space<vmem>>, vector<512x256xbf16>
      %cst_20 = arith.constant dense<0.000000e+00> : vector<8x256xf32>
      %27 = tpu.matmul %20, %26, %cst_20 {dimension_numbers = #tpu.dot_dimension_numbers<[1], [0], [0], [1], [0, 0, 1, 1], [], []>} : vector<8x512xbf16>, vector<512x256xbf16>, vector<8x256xf32> -> vector<8x256xf32>
      %28 = vector.shape_cast %27 : vector<8x256xf32> to vector<8x1x256xf32>
      %29 = vector.shape_cast %25 : vector<8x256xf32> to vector<1x8x256xf32>
      %30 = vector.broadcast %28 : vector<8x1x256xf32> to vector<8x8x256xf32>
      %31 = vector.broadcast %29 : vector<1x8x256xf32> to vector<8x8x256xf32>
      %32 = arith.addf %30, %31 : vector<8x8x256xf32>
      %cst_21 = arith.constant 0.000000e+00 : f32
      %33 = vector.broadcast %cst_21 : f32 to vector<8x8x256xf32>
      %34 = arith.maximumf %32, %33 : vector<8x8x256xf32>
      %c0_22 = arith.constant 0 : index
      %c0_23 = arith.constant 0 : index
      %35 = vector.load %arg7[%c0_22, %c0_23] : memref<1x256xf32, #tpu.memory_space<vmem>>, vector<1x256xf32>
      %36 = vector.shape_cast %35 : vector<1x256xf32> to vector<1x1x256xf32>
      %37 = vector.broadcast %36 : vector<1x1x256xf32> to vector<8x8x256xf32>
      %38 = arith.mulf %34, %37 : vector<8x8x256xf32>
      %cst_24 = arith.constant dense<0.000000e+00> : vector<8x8xf32>
      %39 = vector.multi_reduction <add>, %38, %cst_24 [2] : vector<8x8x256xf32> to vector<8x8xf32>
      %c0_25 = arith.constant 0 : index
      %c0_26 = arith.constant 0 : index
      %40 = vector.load %arg8[%c0_25, %c0_26] : memref<1x1xf32, #tpu.memory_space<vmem>>, vector<1x1xf32>
      %41 = vector.broadcast %40 : vector<1x1xf32> to vector<8x8xf32>
      %42 = arith.addf %39, %41 : vector<8x8xf32>
      %c0_27 = arith.constant 0 : index
      %c0_28 = arith.constant 0 : index
      %c0_29 = arith.constant 0 : index
      %43 = vector.load %arg9[%c0_27, %c0_28, %c0_29] : memref<1x8x8xf32, #tpu.memory_space<vmem>>, vector<1x8x8xf32>
      %44 = vector.shape_cast %43 : vector<1x8x8xf32> to vector<8x8xf32>
      %45 = vector.shape_cast %42 : vector<8x8xf32> to vector<1x8x8xf32>
      tpu.vector_store %arg9[%c0_27, %c0_28, %c0_29], %45 {strides = array<i32>} : memref<1x8x8xf32, #tpu.memory_space<vmem>>, vector<1x8x8xf32>,
    } else {
    }
    return
  }
  func.func @transform_0(%arg0: i32, %arg1: i32) -> (i32, i32, i32) {
    %c0_i32 = arith.constant 0 : i32
    %c0_i32_0 = arith.constant 0 : i32
    return %arg0, %c0_i32, %arg1 : i32, i32, i32
  }
  func.func @transform_1(%arg0: i32, %arg1: i32) -> (i32, i32) {
    %c0_i32 = arith.constant 0 : i32
    %c0_i32_0 = arith.constant 0 : i32
    return %arg1, %c0_i32 : i32, i32
  }
  func.func @transform_2(%arg0: i32, %arg1: i32) -> (i32, i32) {
    %c0_i32 = arith.constant 0 : i32
    %c0_i32_0 = arith.constant 0 : i32
    %c0_i32_1 = arith.constant 0 : i32
    return %c0_i32, %c0_i32_0 : i32, i32
  }
  func.func @transform_3(%arg0: i32, %arg1: i32) -> (i32, i32) {
    %c0_i32 = arith.constant 0 : i32
    %c0_i32_0 = arith.constant 0 : i32
    %c0_i32_1 = arith.constant 0 : i32
    return %c0_i32, %c0_i32_0 : i32, i32
  }
  func.func @transform_4(%arg0: i32, %arg1: i32) -> (i32, i32) {
    %c0_i32 = arith.constant 0 : i32
    %c0_i32_0 = arith.constant 0 : i32
    %c0_i32_1 = arith.constant 0 : i32
    return %c0_i32, %c0_i32_0 : i32, i32
  }
  func.func @transform_5(%arg0: i32, %arg1: i32) -> (i32, i32) {
    %c0_i32 = arith.constant 0 : i32
    %c0_i32_0 = arith.constant 0 : i32
    %c0_i32_1 = arith.constant 0 : i32
    return %c0_i32, %c0_i32_0 : i32, i32
  }
  func.func @transform_6(%arg0: i32, %arg1: i32) -> (i32, i32) {
    %c0_i32 = arith.constant 0 : i32
    %c0_i32_0 = arith.constant 0 : i32
    %c0_i32_1 = arith.constant 0 : i32
    return %c0_i32, %c0_i32_0 : i32, i32
  }
  func.func @transform_7(%arg0: i32, %arg1: i32) -> (i32, i32, i32) {
    %c0_i32 = arith.constant 0 : i32
    %c0_i32_0 = arith.constant 0 : i32
    %c0_i32_1 = arith.constant 0 : i32
    return %arg0, %c0_i32, %c0_i32_0 : i32, i32, i32
  }
}

</mosaic_0001>

<bundles_post_ra>
// kernel: tpu_custom_call.1
= control target key start
LH: loop header
LB: loop body
LE: loop exit
PB: predicated region body
PF: predicated region fallthrough
CT: control target
= control target key end

     0   :  { %s3506_s0 = inlined_call_operand.hbm [shape: bf16[1,16,768], index: 0, kind: input, shape index: {}]   ;;  %s3507_s1 = inlined_call_operand.hbm [shape: bf16[768,512], index: 1, kind: input, shape index: {}]   ;;  %s3508_s2 = inlined_call_operand.vmem [shape: f32[1,512], index: 2, kind: input, shape index: {}]   ;;  %s3509_s3 = inlined_call_operand.hbm [shape: bf16[1024,256], index: 3, kind: input, shape index: {}]   ;;  %s3510_s4 = inlined_call_operand.vmem [shape: f32[1,256], index: 4, kind: input, shape index: {}]   ;;  %s3511_s5 = inlined_call_operand.vmem [shape: f32[1,256], index: 5, kind: input, shape index: {}]   ;;  %s3512_s6 = inlined_call_operand.<no memory space> [shape: f32[1,1], index: 6, kind: input, shape index: {}]   ;;  %s3513_s7 = inlined_call_operand.hbm [shape: f32[1,8,8], index: 7, kind: output, shape index: {}]  }
   0x1   :  { %3521 = sst [smem:[#allocation17_spill]] %s3506_s0  ;;  %v12_v0 = vstv %s3512_s6 }
   0x2   :  { %3522 = sst [smem:[#allocation18_spill]] %s3509_s3  ;;  %13 = vst [vmem:[#allocation3] sm:$0x1] %v12_v0 }
   0x3   :  { %14 = vsyncpa [#allocation5], 0 }
   0x4   :  { %16 = vsyncpa [#allocation5 + $0x1], 0 }
   0x5   :  { %17 = vsyncpa [#allocation8], 0 }
   0x6   :  { %19 = vsyncpa [#allocation8 + $0x1], 0 }
   0x7   :  { %20 = vsyncpa [#allocation6], 0  ;;  %s3115_s26 = smov 0   ;;  %s3117_s27 = smov 0  }
   0x8   :  { %s3119_s28 = smov 0   ;;  %s3121_s29 = smov 0  }
   0x9   :  { %s3123_s30 = smov 0   ;;  %s3125_s8 = smov 0  }
   0xa LB: > { %s3144_s6 = sadd.s32 4294967295, %s3058_s8   ;;  %s47_s9 = sadd.s32 1, %s3046_s28  ;;  %s3058_s8 = sphi %s3125_s8, %s26_s8   ;;  %s3054_s30 = sphi %s3123_s30, %s3545_s30   ;;  %s3050_s29 = sphi %s3121_s29, %s3544_s29   ;;  %s3046_s28 = sphi %s3119_s28, %s3543_s28   ;;  %s3042_s27 = sphi %s3117_s27, %s3542_s27   ;;  %s3038_s26 = sphi %s3115_s26, %s3541_s26  }
   0xb   : > { %p54_p0 = scmp.ne.s32.totalorder %s3046_s28, %s3042_s27  ;;  %p55_p1 = scmp.eq.s32.totalorder %s3058_s8, 0 }
   0xc   : > { %p60_p2 = scmp.ne.s32.totalorder %s3042_s27, %s3038_s26  ;;  %p3514_p3 = scmp.eq.s32.totalorder %s3144_s6, 0 }
   0xd   : > { %p56_p4 = por %p55_p1, %p54_p0  ;;  %p2276_p5 = scmp.ge.s32.totalorder %s3058_s8, 1 }
   0xe   : > { %p3155_p6 = por %p3514_p3, %p60_p2  ;;  %p228_p7 = scmp.lt.s32.totalorder %s3058_s8, 4 }
   0xf   : > { %s3060_s12 = smov [#allocation9]   ;;  %p2528_p10 = scmp.lt.s32.totalorder %s3058_s8, 3 }
  0x10   : > { %s3523_s10 = scalar_select %p3155_p6, 1, 0 }
  0x11   : > { %p3160_p8 = pnand %p2276_p5, %p228_p7  ;;  %s243_s13 = sshll.u32 %s3060_s12, 4  ;;  %s244_s13 = int_to_ptr.vmem [resolvable:$true] %s243_s13 }
  0x12   : > { %p3173_p12 = pnand %p2528_p10, %p56_p4  ;;  %s35_s16 = sadd.s32 1, %s3054_s30 }
  0x13   : > { %s3524_s11 = scalar_select %p3160_p8, 1, 0 }
  0x14   : > { %p2516_p9 = pneg %p3160_p8  ;;  %s3527_s3 = sld [smem:[#allocation18_spill]] }
  0x15   : > { %s3526_s15 = scalar_select %p3173_p12, 1, 0 }
  0x16   : > { %p3169_p11 = pnand %p2516_p9, %p3514_p3 }
  0x18   : > { %p2884_p0 = pneg %p3169_p11 }
  0x1a   : > { %s2882_s19 = scalar_lea.hbm %s3527_s3, 16384 }
  0x1b   : > { %p2883_p13 = scmp.ne.s32.totalorder %s3527_s3, %s2882_s19  ;;  %p2889_p4 = scmp.lt.u32.totalorder %s2882_s19, %s3527_s3 }
  0x1d   : > { %p2885_p1 = pnand %p2884_p0, %p2883_p13 }
  0x1f   : > { %p2886_p2 = pneg %p2885_p1 }
  0x21   : > { %p2891_p5 = pnand %p2889_p4, %p2886_p2 }
  0x23   : > { %2894 = shalt.err (!%p2891_p5)
}
  0x24   : > { %s2895_s24 = scalar_lea.vmem %s244_s13, 16384  ;;  %p2903_p3 = scmp.lt.s32.totalorder %s244_s13, %s244_s13 }
  0x25   : > { %p2896_p7 = scmp.ne.s32.totalorder %s244_s13, %s2895_s24  ;;  %p2904_p6 = scmp.lt.s32.totalorder %s2895_s24, %s2895_s24 }
  0x27   : > { %p2898_p9 = pnand %p2896_p7, %p2884_p0  ;;  %p2905_p8 = por %p2904_p6, %p2903_p3 }
  0x29   : > { %p2899_p10 = pneg %p2898_p9 }
  0x2b   : > { %p2906_p12 = pnand %p2905_p8, %p2899_p10 }
  0x2d   : > { %2909 = shalt.err (!%p2906_p12)
}
  0x2e   : > { %s3518_s25 = smov 128   ;;  %s3519_s26 = smov 8  }
  0x2f   : > { %2519 = dma.hbm_to_vmem [thread:$0]  (!%p3169_p11), %s3527_s3, 16384, %s244_s13, [#allocation8], %s3518_s25, %s3518_s25, %s3519_s26  }
  0x30   : > { %p36_p3 = scmp.ge.s32.totalorder %s35_s16, 3  ;;  %s3198_s18 = sand.u32 1, %s3046_s28  }
  0x31   : > { %s2491_s19 = sshll.u32 %s3054_s30, 7  ;;  %s2279_s20 = sshll.u32 %s3198_s18, 4 }
  0x32   : > { %s3547_s16 = smov (%p36_p3, %s35_s16), 0  ;;  %s3529_s0 = sld [smem:[#allocation17_spill]] }
  0x33   : > { %3528 = sst [smem:[#allocation15_spill]] %s3547_s16  ;;  %s43_s14 = ssub.s32 %s3054_s30, %s3547_s16 }
  0x34   : > { %p45_p6 = scmp.eq.s32.totalorder %s43_s14, 0  ;;  %s270_s13 = scalar_lea.vmem [#allocation4], %s2279_s20 }
  0x35   : > { %s279_s24 = sshll.u32 %s270_s13, 4  ;;  %s267_s25 = scalar_lea.sflag [#allocation5], %s3198_s18  ;;  %s3216_s24 = int_to_ptr.vmem [resolvable:$true] %s279_s24 }
  0x36   : > { %s3214_s12 = scalar_select %p45_p6, %s3046_s28, %s47_s9  }
  0x37   : > { %p3531_p11 = scmp.ne.s32.totalorder %s3526_s15, 0 }
  0x38   : > { %s3209_s23 = scalar_lea.hbm %s3529_s0, %s2491_s19  ;;  %3530 = sst [smem:[#allocation16_spill]] %s3214_s12 }
  0x39   : > { %s2910_s26 = scalar_lea.hbm %s3209_s23, 256  ;;  %p2912_p12 = pneg %p3531_p11 }
  0x3a   : > { %p2911_p8 = scmp.ne.s32.totalorder %s3209_s23, %s2910_s26  ;;  %s2915_s20 = scalar_lea.hbm %s3529_s0, 768 }
  0x3b   : > { %p2916_p1 = scmp.lt.u32.totalorder %s3209_s23, %s3529_s0  ;;  %p2917_p2 = scmp.lt.u32.totalorder %s2915_s20, %s2910_s26 }
  0x3c   : > { %p2913_p13 = pnand %p2912_p12, %p2911_p8  ;;  %p2919_p5 = scmp.lt.u32.totalorder %s2910_s26, %s3209_s23 }
  0x3d   : > { %p2918_p4 = por %p2917_p2, %p2916_p1 }
  0x3e   : > { %p2914_p0 = pneg %p2913_p13 }
  0x3f   : > { %p2920_p7 = por %p2919_p5, %p2918_p4 }
  0x41   : > { %p2921_p9 = pnand %p2920_p7, %p2914_p0 }
  0x43   : > { %2924 = shalt.err (!%p2921_p9)
}
  0x44   : > { %s2925_s9 = scalar_lea.vmem %s3216_s24, 256  ;;  %s3063_s13 = smov [#allocation4]  }
  0x45   : > { %p2926_p10 = scmp.ne.s32.totalorder %s3216_s24, %s2925_s9  ;;  %s2930_s19 = sshll.u32 %s3063_s13, 4  ;;  %s2931_s19 = int_to_ptr.vmem [resolvable:$false] %s2930_s19 }
  0x46   : > { %s2932_s14 = scalar_lea.vmem %s2931_s19, 512  ;;  %p2933_p8 = scmp.lt.s32.totalorder %s3216_s24, %s2931_s19 }
  0x47   : > { %p2928_p3 = pnand %p2926_p10, %p2912_p12  ;;  %p2934_p13 = scmp.lt.s32.totalorder %s2932_s14, %s2925_s9 }
  0x49   : > { %p2929_p6 = pneg %p2928_p3  ;;  %p2935_p1 = por %p2934_p13, %p2933_p8 }
  0x4b   : > { %p2936_p2 = pnand %p2935_p1, %p2929_p6 }
  0x4d   : > { %2939 = shalt.err (!%p2936_p2)
}
  0x4e   : > { %s3064_s26 = smov 384   ;;  %s3532_s20 = smov 8  }
  0x4f   : > { %s3533_s21 = smov 128   ;;  %s2282_s22 = sshll.u32 %s3198_s18, 9 }
  0x50   : > { %2523 = dma.hbm_to_vmem [thread:$0]  (!%p3531_p11), %s3209_s23, 256, %s3216_s24, %s267_s25, %s3064_s26, %s3533_s21, %s3532_s20  }
  0x51   : > { %s2493_s13 = sshll.u32 %s3054_s30, 13  ;;  %s293_s17 = scalar_lea.vmem [#allocation7], %s2282_s22 }
  0x52   : > { %s3254_s14 = scalar_lea.hbm %s3507_s1, %s2493_s13  ;;  %s301_s0 = sshll.u32 %s293_s17, 4  ;;  %s3256_s0 = int_to_ptr.vmem [resolvable:$true] %s301_s0 }
  0x53   : > { %s3534_s3 = sand.u32 1, %s3058_s8   ;;  %s2940_s12 = scalar_lea.hbm %s3254_s14, 8192 }
  0x54   : > { %s3260_s16 = scalar_lea.sflag [#allocation8], %s3534_s3  ;;  %p2941_p0 = scmp.ne.s32.totalorder %s3254_s14, %s2940_s12 }
  0x55   : > { %s2945_s23 = scalar_lea.hbm %s3507_s1, 24576  ;;  %p2946_p7 = scmp.lt.u32.totalorder %s3254_s14, %s3507_s1 }
  0x56   : > { %p2943_p4 = pnand %p2941_p0, %p2912_p12  ;;  %p2947_p9 = scmp.lt.u32.totalorder %s2945_s23, %s2940_s12 }
  0x57   : > { %p2949_p3 = scmp.lt.u32.totalorder %s2940_s12, %s3254_s14 }
  0x58   : > { %p2944_p5 = pneg %p2943_p4  ;;  %p2948_p10 = por %p2947_p9, %p2946_p7 }
  0x5a   : > { %p2950_p6 = por %p2949_p3, %p2948_p10 }
  0x5c   : > { %p2951_p8 = pnand %p2950_p6, %p2944_p5 }
  0x5e   : > { %2954 = shalt.err (!%p2951_p8)
}
  0x5f   : > { %s2955_s3 = scalar_lea.vmem %s3256_s0, 8192  ;;  %s3065_s17 = smov [#allocation7]  }
  0x60   : > { %p2956_p13 = scmp.ne.s32.totalorder %s3256_s0, %s2955_s3  ;;  %s2960_s20 = sshll.u32 %s3065_s17, 4  ;;  %s2961_s20 = int_to_ptr.vmem [resolvable:$false] %s2960_s20 }
  0x61   : > { %s2962_s21 = scalar_lea.vmem %s2961_s20, 16384  ;;  %p2963_p0 = scmp.lt.s32.totalorder %s3256_s0, %s2961_s20 }
  0x62   : > { %p2958_p1 = pnand %p2956_p13, %p2912_p12  ;;  %p2964_p4 = scmp.lt.s32.totalorder %s2962_s21, %s2955_s3 }
  0x64   : > { %p2959_p2 = pneg %p2958_p1  ;;  %p2965_p7 = por %p2964_p4, %p2963_p0 }
  0x66   : > { %p2966_p9 = pnand %p2965_p7, %p2959_p2 }
  0x68   : > { %2969 = shalt.err (!%p2966_p9)
}
  0x69   : > { %s3066_s12 = smov 256   ;;  %s3067_s22 = smov 16  }
  0x6a   : > { %2526 = dma.hbm_to_vmem [thread:$0]  (!%p3531_p11), %s3254_s14, 8192, %s3256_s0, %s3260_s16, %s3066_s12, %s3066_s12, %s3067_s22  }
  0x6b   : > { %p3535_p12 = scmp.ne.s32.totalorder %s3524_s11, 0 }
  0x6c   : > { %s315_s13 = sand.u32 (!%p3535_p12), 1, %s3042_s27   ;;  %p3536_p5 = scmp.ne.s32.totalorder (!%p3535_p12), %s3523_s10, 0 }
  0x6d   : > { %313 = sbr.rel (%p3535_p12) target bundleno = 930 (0x3a2), region = 48  ;;  %s2287_s9 = sshll.u32 (!%p3535_p12), %s315_s13, 4 }
  0x6e   : > { %s316_s19 = scalar_lea.sflag (!%p3535_p12), [#allocation5], %s315_s13  ;;  %s3289_s25 = scalar_lea.vmem (!%p3535_p12), [#allocation4], %s2287_s9 }
  0x74   : > { %3021 = dma.done.wait (%p3536_p5), %s316_s19, 256  }
  0x75   : > { %3023 = vsyncadd (%p3536_p5), %s316_s19, 4294967040  ;;  %s324_s18 = sand.u32 1, %s3144_s6   ;;  %s2288_s15 = sshll.u32 %s315_s13, 9 }
  0x76   : > { %s325_s0 = scalar_lea.sflag [#allocation8], %s324_s18  ;;  %s3296_s16 = scalar_lea.vmem [#allocation7], %s2288_s15 }
  0x77   : > { %3025 = dma.done.wait (%p3536_p5), %s325_s0, 8192  }
  0x78   : > { %3027 = vsyncadd (%p3536_p5), %s325_s0, 4294959104  ;;  %p3537_p11 = scmp.eq.s32.totalorder %s3144_s6, 0 }
  0x7a   : > { %3029 = dma.done.wait (%p3537_p11), [#allocation8], 16384   ;;  %p3538_p10 = pmov %p3537_p11 }
  0x7b   : > { %p2290_p3 = scmp.ne.s32.totalorder %s3050_s29, 0 }
  0x7c   : > { %3031 = vsyncadd (%p3538_p10), [#allocation8], 4294950912  ;;  %v3068_v1 = vmov (!%p2290_p3), 0.0  }
  0x7d   : > { %368 = sbr.rel (%p2290_p3) target bundleno = 132 (0x84), region = 64  ;;  %369 = vst [vmem:[#allocation2] sm:$0xff] (!%p2290_p3), %v3068_v1  ;;  %370 = vst [vmem:[#allocation2 + $0x8] sm:$0xff] (!%p2290_p3), %v3068_v1 }
  0x7e   : > { %371 = vst [vmem:[#allocation2 + $0x10] sm:$0xff] (!%p2290_p3), %v3068_v1  ;;  %372 = vst [vmem:[#allocation2 + $0x18] sm:$0xff] (!%p2290_p3), %v3068_v1 }
  0x7f   : > { %373 = vst [vmem:[#allocation2 + $0x20] sm:$0xff] (!%p2290_p3), %v3068_v1  ;;  %374 = vst [vmem:[#allocation2 + $0x28] sm:$0xff] (!%p2290_p3), %v3068_v1 }
  0x80   : > { %375 = vst [vmem:[#allocation2 + $0x30] sm:$0xff] (!%p2290_p3), %v3068_v1  ;;  %376 = vst [vmem:[#allocation2 + $0x38] sm:$0xff] (!%p2290_p3), %v3068_v1 }
  0x84 PF: > { %v2590_v2 = vld [vmem:[%s3296_s16 + $0x4] ss:$16 sps:$4 sm:$0xff]   ;;  %v2592_v3 = vld [vmem:[%s3296_s16 + $0xc] ss:$16 sps:$4 sm:$0xff]   ;;  %v2594_v4 = vld [vmem:[%s3296_s16] ss:$16 sps:$4 sm:$0xff]  }
  0x85   : > { %781 = vmatprep.subr.bf16.mxu0 %v2590_v2  ;;  %v2595_v5 = vld [vmem:[%s3296_s16 + $0x8] ss:$16 sps:$4 sm:$0xff]   ;;  %824 = vmatprep.subr.bf16.mxu1 %v2592_v3  ;;  %v2596_v6 = vld [vmem:[%s3296_s16 + $0x24] ss:$16 sps:$4 sm:$0xff]   ;;  %v2598_v7 = vld [vmem:[%s3296_s16 + $0x2c] ss:$16 sps:$4 sm:$0xff]  }
  0x86   : > { %782 = vmatpush1.bf16.msra.mxu0 %v2594_v4  ;;  %825 = vmatpush1.bf16.msra.mxu1 %v2595_v5  ;;  %v2600_v8 = vld [vmem:[%s3296_s16 + $0x20] ss:$16 sps:$4 sm:$0xff]   ;;  %v2601_v9 = vld [vmem:[%s3296_s16 + $0x28] ss:$16 sps:$4 sm:$0xff]   ;;  %v2602_v10 = vld [vmem:[%s3296_s16 + $0x44] ss:$16 sps:$4 sm:$0xff]  }
  0x87   : > { %783 = vmatprep.subr.bf16.mxu0 %v2596_v6  ;;  %826 = vmatprep.subr.bf16.mxu1 %v2598_v7  ;;  %v2604_v11 = vld [vmem:[%s3296_s16 + $0x4c] ss:$16 sps:$4 sm:$0xff]   ;;  %v2606_v12 = vld [vmem:[%s3296_s16 + $0x40] ss:$16 sps:$4 sm:$0xff]   ;;  %v2607_v13 = vld [vmem:[%s3296_s16 + $0x48] ss:$16 sps:$4 sm:$0xff]  }
  0x88   : > { %v2608_v14 = vld [vmem:[%s3296_s16 + $0x64] ss:$16 sps:$4 sm:$0xff]   ;;  %v2610_v15 = vld [vmem:[%s3296_s16 + $0x6c] ss:$16 sps:$4 sm:$0xff]   ;;  %v2612_v16 = vld [vmem:[%s3296_s16 + $0x60] ss:$16 sps:$4 sm:$0xff]  }
  0x89   : > { %v2613_v17 = vld [vmem:[%s3296_s16 + $0x68] ss:$16 sps:$4 sm:$0xff]   ;;  %v2614_v18 = vld [vmem:[%s3296_s16 + $0x84] ss:$16 sps:$4 sm:$0xff]   ;;  %v2616_v19 = vld [vmem:[%s3296_s16 + $0x8c] ss:$16 sps:$4 sm:$0xff]  }
  0x8a   : > { %784 = vmatpush1.bf16.msra.mxu0 %v2600_v8  ;;  %827 = vmatpush1.bf16.msra.mxu1 %v2601_v9  ;;  %v2618_v20 = vld [vmem:[%s3296_s16 + $0x80] ss:$16 sps:$4 sm:$0xff]   ;;  %v2619_v21 = vld [vmem:[%s3296_s16 + $0x88] ss:$16 sps:$4 sm:$0xff]   ;;  %v2620_v22 = vld [vmem:[%s3296_s16 + $0xa4] ss:$16 sps:$4 sm:$0xff]  }
  0x8b   : > { %785 = vmatprep.subr.bf16.mxu0 %v2602_v10  ;;  %828 = vmatprep.subr.bf16.mxu1 %v2604_v11  ;;  %v2622_v23 = vld [vmem:[%s3296_s16 + $0xac] ss:$16 sps:$4 sm:$0xff]   ;;  %v2624_v24 = vld [vmem:[%s3296_s16 + $0xa0] ss:$16 sps:$4 sm:$0xff]   ;;  %v2625_v25 = vld [vmem:[%s3296_s16 + $0xa8] ss:$16 sps:$4 sm:$0xff]  }
  0x8c   : > { %v2626_v26 = vld [vmem:[%s3296_s16 + $0xc4] ss:$16 sps:$4 sm:$0xff]   ;;  %v2628_v27 = vld [vmem:[%s3296_s16 + $0xcc] ss:$16 sps:$4 sm:$0xff]   ;;  %v2630_v28 = vld [vmem:[%s3296_s16 + $0xc0] ss:$16 sps:$4 sm:$0xff]  }
  0x8d   : > { %v2631_v29 = vld [vmem:[%s3296_s16 + $0xc8] ss:$16 sps:$4 sm:$0xff]   ;;  %v2632_v30 = vld [vmem:[%s3296_s16 + $0xe4] ss:$16 sps:$4 sm:$0xff]   ;;  %v2634_v31 = vld [vmem:[%s3296_s16 + $0xec] ss:$16 sps:$4 sm:$0xff]  }
  0x8e   : > { %786 = vmatpush1.bf16.msra.mxu0 %v2606_v12  ;;  %829 = vmatpush1.bf16.msra.mxu1 %v2607_v13  ;;  %v2636_v32 = vld [vmem:[%s3296_s16 + $0xe0] ss:$16 sps:$4 sm:$0xff]   ;;  %v2637_v33 = vld [vmem:[%s3296_s16 + $0xe8] ss:$16 sps:$4 sm:$0xff]   ;;  %v2638_v34 = vld [vmem:[%s3296_s16 + $0x104] ss:$16 sps:$4 sm:$0xff]  }
  0x8f   : > { %787 = vmatprep.subr.bf16.mxu0 %v2608_v14  ;;  %830 = vmatprep.subr.bf16.mxu1 %v2610_v15  ;;  %v2640_v35 = vld [vmem:[%s3296_s16 + $0x10c] ss:$16 sps:$4 sm:$0xff]   ;;  %v2642_v36 = vld [vmem:[%s3296_s16 + $0x100] ss:$16 sps:$4 sm:$0xff]   ;;  %v2643_v37 = vld [vmem:[%s3296_s16 + $0x108] ss:$16 sps:$4 sm:$0xff]  }
  0x90   : > { %v2644_v38 = vld [vmem:[%s3296_s16 + $0x124] ss:$16 sps:$4 sm:$0xff]   ;;  %v2646_v39 = vld [vmem:[%s3296_s16 + $0x12c] ss:$16 sps:$4 sm:$0xff]   ;;  %v2648_v40 = vld [vmem:[%s3296_s16 + $0x120] ss:$16 sps:$4 sm:$0xff]  }
  0x91   : > { %v2649_v41 = vld [vmem:[%s3296_s16 + $0x128] ss:$16 sps:$4 sm:$0xff]   ;;  %v2650_v42 = vld [vmem:[%s3296_s16 + $0x144] ss:$16 sps:$4 sm:$0xff]   ;;  %v2652_v43 = vld [vmem:[%s3296_s16 + $0x14c] ss:$16 sps:$4 sm:$0xff]  }
  0x92   : > { %788 = vmatpush1.bf16.msra.mxu0 %v2612_v16  ;;  %831 = vmatpush1.bf16.msra.mxu1 %v2613_v17  ;;  %v2654_v44 = vld [vmem:[%s3296_s16 + $0x140] ss:$16 sps:$4 sm:$0xff]   ;;  %v2655_v45 = vld [vmem:[%s3296_s16 + $0x148] ss:$16 sps:$4 sm:$0xff]   ;;  %v2656_v46 = vld [vmem:[%s3296_s16 + $0x164] ss:$16 sps:$4 sm:$0xff]  }
  0x93   : > { %789 = vmatprep.subr.bf16.mxu0 %v2614_v18  ;;  %832 = vmatprep.subr.bf16.mxu1 %v2616_v19  ;;  %v2658_v47 = vld [vmem:[%s3296_s16 + $0x16c] ss:$16 sps:$4 sm:$0xff]   ;;  %v2660_v49 = vld [vmem:[%s3296_s16 + $0x160] ss:$16 sps:$4 sm:$0xff]   ;;  %v2661_v50 = vld [vmem:[%s3296_s16 + $0x168] ss:$16 sps:$4 sm:$0xff]  }
  0x94   : > { %v2688_v48 = vld [vmem:[%s3289_s25 + $0x4] ss:$8 sps:$4 sm:$0xff]   ;;  %v2666_v53 = vld [vmem:[%s3296_s16 + $0x180] ss:$16 sps:$4 sm:$0xff]   ;;  %v2667_v54 = vld [vmem:[%s3296_s16 + $0x188] ss:$16 sps:$4 sm:$0xff]  }
  0x95   : > { %v2662_v51 = vld [vmem:[%s3296_s16 + $0x184] ss:$16 sps:$4 sm:$0xff]   ;;  %v2664_v52 = vld [vmem:[%s3296_s16 + $0x18c] ss:$16 sps:$4 sm:$0xff]   ;;  %813 = vmatprep.mubr.bf16.mxu0 %v2688_v48  ;;  %856 = vmatprep.mubr.bf16.mxu1 %v2688_v48  ;;  %v2672_v57 = vld [vmem:[%s3296_s16 + $0x1a0] ss:$16 sps:$4 sm:$0xff]  }
  0x96   : > { %790 = vmatpush1.bf16.msra.mxu0 %v2618_v20  ;;  %833 = vmatpush1.bf16.msra.mxu1 %v2619_v21  ;;  %v2668_v55 = vld [vmem:[%s3296_s16 + $0x1a4] ss:$16 sps:$4 sm:$0xff]   ;;  %v2670_v56 = vld [vmem:[%s3296_s16 + $0x1ac] ss:$16 sps:$4 sm:$0xff]   ;;  %v2673_v58 = vld [vmem:[%s3296_s16 + $0x1a8] ss:$16 sps:$4 sm:$0xff]  }
  0x97   : > { %791 = vmatprep.subr.bf16.mxu0 %v2620_v22  ;;  %834 = vmatprep.subr.bf16.mxu1 %v2622_v23  ;;  %v2674_v59 = vld [vmem:[%s3296_s16 + $0x1c4] ss:$16 sps:$4 sm:$0xff]   ;;  %v2676_v60 = vld [vmem:[%s3296_s16 + $0x1cc] ss:$16 sps:$4 sm:$0xff]   ;;  %v2678_v61 = vld [vmem:[%s3296_s16 + $0x1c0] ss:$16 sps:$4 sm:$0xff]  }
  0x98   : > { %v2679_v62 = vld [vmem:[%s3296_s16 + $0x1c8] ss:$16 sps:$4 sm:$0xff]   ;;  %v2680_v63 = vld [vmem:[%s3296_s16 + $0x1e4] ss:$16 sps:$4 sm:$0xff]   ;;  %v2682_v0 = vld [vmem:[%s3296_s16 + $0x1ec] ss:$16 sps:$4 sm:$0xff]  }
  0x99   : > { %v2684_v1 = vld [vmem:[%s3296_s16 + $0x1e0] ss:$16 sps:$4 sm:$0xff]   ;;  %v2685_v2 = vld [vmem:[%s3296_s16 + $0x1e8] ss:$16 sps:$4 sm:$0xff]   ;;  %p2357_p6 = scmp.ne.s32.totalorder %s3050_s29, 2 }
  0x9a   : > { %792 = vmatpush1.bf16.msra.mxu0 %v2624_v24  ;;  %835 = vmatpush1.bf16.msra.mxu1 %v2625_v25  ;;  %v2686_v3 = vld [vmem:[%s3289_s25] ss:$8 sps:$4 sm:$0xff]   ;;  %v2720_v48 = vld [vmem:[#allocation9 + $0x54] ss:$8 sps:$4 sm:$0xff] (!%p2357_p6)   ;;  %vm2153_vm0 = vcmask (!%p2357_p6), 1041409   ;;  %vm2155_vm1 = vcmask (!%p2357_p6), 1042434  }
  0x9b   : > { %793 = vmatprep.subr.bf16.mxu0 %v2626_v26  ;;  %836 = vmatprep.subr.bf16.mxu1 %v2628_v27  ;;  %v377_v4 = vld [vmem:[#allocation2] sm:$0xff]  ;;  %v379_v5 = vld [vmem:[#allocation2 + $0x10] sm:$0xff]  ;;  %v378_v6 = vld [vmem:[#allocation2 + $0x8] sm:$0xff]  ;;  %vm2157_vm2 = vcmask (!%p2357_p6), 1043459   ;;  %vm2159_vm3 = vcmask (!%p2357_p6), 1044484   ;;  %vm2161_vm4 = vcmask (!%p2357_p6), 1045509  }
  0x9c   : > { %v380_v7 = vld [vmem:[#allocation2 + $0x18] sm:$0xff]  ;;  %v381_v10 = vld [vmem:[#allocation2 + $0x20] sm:$0xff]  ;;  %v383_v11 = vld [vmem:[#allocation2 + $0x30] sm:$0xff]  ;;  %vm2163_vm5 = vcmask (!%p2357_p6), 1046534   ;;  %vm2165_vm6 = vcmask (!%p2357_p6), 1047559   ;;  %vm2168_vm7 = vcmask (!%p2357_p6), 64512  }
  0x9d   : > { %v382_v16 = vld [vmem:[#allocation2 + $0x28] sm:$0xff]  ;;  %v384_v17 = vld [vmem:[#allocation2 + $0x38] sm:$0xff] }
  0x9e   : > { %794 = vmatpush1.bf16.msra.mxu0 %v2630_v28  ;;  %837 = vmatpush1.bf16.msra.mxu1 %v2631_v29  ;;  %v2690_v28 = vld [vmem:[#allocation9 + $0x4] ss:$8 sps:$4 sm:$0xff] (!%p2357_p6)  }
  0x9f   : > { %795 = vmatprep.subr.bf16.mxu0 %v2632_v30  ;;  %838 = vmatprep.subr.bf16.mxu1 %v2634_v31  ;;  %v2692_v29 = vld [vmem:[#allocation9 + $0x204] ss:$8 sps:$4 sm:$0xff] (!%p2357_p6)   ;;  %v2694_v30 = vld [vmem:[#allocation9] ss:$8 sps:$4 sm:$0xff] (!%p2357_p6)  }
  0xa0   : > { %v2695_v31 = vld [vmem:[#allocation9 + $0x200] ss:$8 sps:$4 sm:$0xff] (!%p2357_p6)  }
  0xa2   : > { %796 = vmatpush1.bf16.msra.mxu0 %v2636_v32  ;;  %839 = vmatpush1.bf16.msra.mxu1 %v2637_v33  ;;  %v2696_v32 = vld [vmem:[#allocation9 + $0x14] ss:$8 sps:$4 sm:$0xff] (!%p2357_p6)  }
  0xa3   : > { %797 = vmatprep.subr.bf16.mxu0 %v2638_v34  ;;  %840 = vmatprep.subr.bf16.mxu1 %v2640_v35  ;;  %v2698_v33 = vld [vmem:[#allocation9 + $0x214] ss:$8 sps:$4 sm:$0xff] (!%p2357_p6)   ;;  %v2700_v34 = vld [vmem:[#allocation9 + $0x10] ss:$8 sps:$4 sm:$0xff] (!%p2357_p6)  }
  0xa4   : > { %v2701_v35 = vld [vmem:[#allocation9 + $0x210] ss:$8 sps:$4 sm:$0xff] (!%p2357_p6)  }
  0xa6   : > { %798 = vmatpush1.bf16.msra.mxu0 %v2642_v36  ;;  %841 = vmatpush1.bf16.msra.mxu1 %v2643_v37  ;;  %v2702_v36 = vld [vmem:[#allocation9 + $0x24] ss:$8 sps:$4 sm:$0xff] (!%p2357_p6)  }
  0xa7   : > { %799 = vmatprep.subr.bf16.mxu0 %v2644_v38  ;;  %842 = vmatprep.subr.bf16.mxu1 %v2646_v39  ;;  %v2704_v37 = vld [vmem:[#allocation9 + $0x224] ss:$8 sps:$4 sm:$0xff] (!%p2357_p6)   ;;  %v2706_v38 = vld [vmem:[#allocation9 + $0x20] ss:$8 sps:$4 sm:$0xff] (!%p2357_p6)  }
  0xa8   : > { %v2707_v39 = vld [vmem:[#allocation9 + $0x220] ss:$8 sps:$4 sm:$0xff] (!%p2357_p6)  }
  0xaa   : > { %800 = vmatpush1.bf16.msra.mxu0 %v2648_v40  ;;  %843 = vmatpush1.bf16.msra.mxu1 %v2649_v41  ;;  %v2708_v40 = vld [vmem:[#allocation9 + $0x34] ss:$8 sps:$4 sm:$0xff] (!%p2357_p6)  }
  0xab   : > { %801 = vmatprep.subr.bf16.mxu0 %v2650_v42  ;;  %844 = vmatprep.subr.bf16.mxu1 %v2652_v43  ;;  %v2710_v41 = vld [vmem:[#allocation9 + $0x234] ss:$8 sps:$4 sm:$0xff] (!%p2357_p6)   ;;  %v2712_v42 = vld [vmem:[#allocation9 + $0x30] ss:$8 sps:$4 sm:$0xff] (!%p2357_p6)  }
  0xac   : > { %v2713_v43 = vld [vmem:[#allocation9 + $0x230] ss:$8 sps:$4 sm:$0xff] (!%p2357_p6)  }
  0xae   : > { %802 = vmatpush1.bf16.msra.mxu0 %v2654_v44  ;;  %845 = vmatpush1.bf16.msra.mxu1 %v2655_v45  ;;  %v2714_v44 = vld [vmem:[#allocation9 + $0x44] ss:$8 sps:$4 sm:$0xff] (!%p2357_p6)  }
  0xaf   : > { %803 = vmatprep.subr.bf16.mxu0 %v2656_v46  ;;  %846 = vmatprep.subr.bf16.mxu1 %v2658_v47  ;;  %v2716_v45 = vld [vmem:[#allocation9 + $0x244] ss:$8 sps:$4 sm:$0xff] (!%p2357_p6)   ;;  %v2718_v46 = vld [vmem:[#allocation9 + $0x40] ss:$8 sps:$4 sm:$0xff] (!%p2357_p6)  }
  0xb0   : > { %v2719_v47 = vld [vmem:[#allocation9 + $0x240] ss:$8 sps:$4 sm:$0xff] (!%p2357_p6)  }
  0xb2   : > { %804 = vmatpush1.bf16.msra.mxu0 %v2660_v49  ;;  %847 = vmatpush1.bf16.msra.mxu1 %v2661_v50  ;;  %v2722_v49 = vld [vmem:[#allocation9 + $0x254] ss:$8 sps:$4 sm:$0xff] (!%p2357_p6)   ;;  %v2724_v50 = vld [vmem:[#allocation9 + $0x50] ss:$8 sps:$4 sm:$0xff] (!%p2357_p6)  }
  0xb3   : > { %805 = vmatprep.subr.bf16.mxu0 %v2662_v51  ;;  %848 = vmatprep.subr.bf16.mxu1 %v2664_v52  ;;  %v2725_v51 = vld [vmem:[#allocation9 + $0x250] ss:$8 sps:$4 sm:$0xff] (!%p2357_p6)   ;;  %v2726_v52 = vld [vmem:[#allocation9 + $0x64] ss:$8 sps:$4 sm:$0xff] (!%p2357_p6)  }
  0xb6   : > { %806 = vmatpush1.bf16.msra.mxu0 %v2666_v53  ;;  %849 = vmatpush1.bf16.msra.mxu1 %v2667_v54  ;;  %v2728_v53 = vld [vmem:[#allocation9 + $0x264] ss:$8 sps:$4 sm:$0xff] (!%p2357_p6)   ;;  %v2730_v54 = vld [vmem:[#allocation9 + $0x60] ss:$8 sps:$4 sm:$0xff] (!%p2357_p6)  }
  0xb7   : > { %807 = vmatprep.subr.bf16.mxu0 %v2668_v55  ;;  %850 = vmatprep.subr.bf16.mxu1 %v2670_v56  ;;  %v2731_v55 = vld [vmem:[#allocation9 + $0x260] ss:$8 sps:$4 sm:$0xff] (!%p2357_p6)   ;;  %v2732_v56 = vld [vmem:[#allocation9 + $0x74] ss:$8 sps:$4 sm:$0xff] (!%p2357_p6)  }
  0xba   : > { %808 = vmatpush1.bf16.msra.mxu0 %v2672_v57  ;;  %851 = vmatpush1.bf16.msra.mxu1 %v2673_v58  ;;  %v2734_v57 = vld [vmem:[#allocation9 + $0x274] ss:$8 sps:$4 sm:$0xff] (!%p2357_p6)   ;;  %v2736_v58 = vld [vmem:[#allocation9 + $0x70] ss:$8 sps:$4 sm:$0xff] (!%p2357_p6)  }
  0xbb   : > { %809 = vmatprep.subr.bf16.mxu0 %v2674_v59  ;;  %852 = vmatprep.subr.bf16.mxu1 %v2676_v60  ;;  %v2737_v59 = vld [vmem:[#allocation9 + $0x270] ss:$8 sps:$4 sm:$0xff] (!%p2357_p6)   ;;  %v2738_v60 = vld [vmem:[#allocation9 + $0x84] ss:$8 sps:$4 sm:$0xff] (!%p2357_p6)  }
  0xbe   : > { %810 = vmatpush1.bf16.msra.mxu0 %v2678_v61  ;;  %853 = vmatpush1.bf16.msra.mxu1 %v2679_v62  ;;  %v2740_v61 = vld [vmem:[#allocation9 + $0x284] ss:$8 sps:$4 sm:$0xff] (!%p2357_p6)   ;;  %v2742_v62 = vld [vmem:[#allocation9 + $0x80] ss:$8 sps:$4 sm:$0xff] (!%p2357_p6)  }
  0xbf   : > { %811 = vmatprep.subr.bf16.mxu0 %v2680_v63  ;;  %854 = vmatprep.subr.bf16.mxu1 %v2682_v0  ;;  %v2743_v63 = vld [vmem:[#allocation9 + $0x280] ss:$8 sps:$4 sm:$0xff] (!%p2357_p6)   ;;  %v2744_v0 = vld [vmem:[#allocation9 + $0x94] ss:$8 sps:$4 sm:$0xff] (!%p2357_p6)  }
  0xc2   : > { %812 = vmatpush1.bf16.msra.mxu0 %v2684_v1  ;;  %855 = vmatpush1.bf16.msra.mxu1 %v2685_v2  ;;  %v897_v1 = vlaneseq (!%p2357_p6)  ;;  %v2746_v2 = vld [vmem:[#allocation9 + $0x294] ss:$8 sps:$4 sm:$0xff] (!%p2357_p6)  }
  0xc3   : > { %1329 = vmatprep.subr.bf16.mxu0 (!%p2357_p6), %v2690_v28  ;;  %1795 = vmatprep.subr.bf16.mxu1 (!%p2357_p6), %v2692_v29  ;;  %v2770_v28 = vld [vmem:[#allocation9 + $0x2d4] ss:$8 sps:$4 sm:$0xff] (!%p2357_p6)   ;;  %v2772_v29 = vld [vmem:[#allocation9 + $0xd0] ss:$8 sps:$4 sm:$0xff] (!%p2357_p6)  }
  0xc5   : > { %814 = vmatmul.mubr.bf16.vlgmr.msra.gmra.mrb[0].mxu0 %v2686_v3  ;;  %857 = vmatmul.mubr.bf16.vlgmr.msra.gmra.mrb[0].mxu1 %v2686_v3  ;;  %v2748_v3 = vld [vmem:[#allocation9 + $0x90] ss:$8 sps:$4 sm:$0xff] (!%p2357_p6)  }
  0xc6   : > { %1330 = vmatpush1.bf16.msra.mxu0 (!%p2357_p6), %v2694_v30  ;;  %1796 = vmatpush1.bf16.msra.mxu1 (!%p2357_p6), %v2695_v31  ;;  %v2773_v31 = vld [vmem:[#allocation9 + $0x2d0] ss:$8 sps:$4 sm:$0xff] (!%p2357_p6)  }
  0xc7   : > { %1331 = vmatprep.subr.bf16.mxu0 (!%p2357_p6), %v2696_v32  ;;  %1797 = vmatprep.subr.bf16.mxu1 (!%p2357_p6), %v2698_v33  ;;  %v2774_v32 = vld [vmem:[#allocation9 + $0xe4] ss:$8 sps:$4 sm:$0xff] (!%p2357_p6)  }
  0xc8   : > { %v2776_v33 = vld [vmem:[#allocation9 + $0x2e4] ss:$8 sps:$4 sm:$0xff] (!%p2357_p6)  }
  0xca   : > { %1332 = vmatpush1.bf16.msra.mxu0 (!%p2357_p6), %v2700_v34  ;;  %1798 = vmatpush1.bf16.msra.mxu1 (!%p2357_p6), %v2701_v35  ;;  %v2778_v34 = vld [vmem:[#allocation9 + $0xe0] ss:$8 sps:$4 sm:$0xff] (!%p2357_p6)  }
  0xcb   : > { %1333 = vmatprep.subr.bf16.mxu0 (!%p2357_p6), %v2702_v36  ;;  %1799 = vmatprep.subr.bf16.mxu1 (!%p2357_p6), %v2704_v37  ;;  %v2779_v35 = vld [vmem:[#allocation9 + $0x2e0] ss:$8 sps:$4 sm:$0xff] (!%p2357_p6)  }
  0xce   : > { %1334 = vmatpush1.bf16.msra.mxu0 (!%p2357_p6), %v2706_v38  ;;  %1800 = vmatpush1.bf16.msra.mxu1 (!%p2357_p6), %v2707_v39  ;;  %v2780_v39 = vld [vmem:[#allocation9 + $0xf4] ss:$8 sps:$4 sm:$0xff] (!%p2357_p6)  }
  0xcf   : > { %1335 = vmatprep.subr.bf16.mxu0 (!%p2357_p6), %v2708_v40  ;;  %1801 = vmatprep.subr.bf16.mxu1 (!%p2357_p6), %v2710_v41  ;;  %v2782_v40 = vld [vmem:[#allocation9 + $0x2f4] ss:$8 sps:$4 sm:$0xff] (!%p2357_p6)   ;;  %v2784_v41 = vld [vmem:[#allocation9 + $0xf0] ss:$8 sps:$4 sm:$0xff] (!%p2357_p6)  }
  0xd2   : > { %1336 = vmatpush1.bf16.msra.mxu0 (!%p2357_p6), %v2712_v42  ;;  %1802 = vmatpush1.bf16.msra.mxu1 (!%p2357_p6), %v2713_v43 }
  0xd3   : > { %1337 = vmatprep.subr.bf16.mxu0 (!%p2357_p6), %v2714_v44  ;;  %1803 = vmatprep.subr.bf16.mxu1 (!%p2357_p6), %v2716_v45  ;;  %v2785_v44 = vld [vmem:[#allocation9 + $0x2f0] ss:$8 sps:$4 sm:$0xff] (!%p2357_p6)   ;;  %v2788_v45 = vld [vmem:[#allocation9 + $0x104] ss:$8 sps:$4 sm:$0xff] (!%p2357_p6)  }
  0xd6   : > { %1338 = vmatpush1.bf16.msra.mxu0 (!%p2357_p6), %v2718_v46  ;;  %1804 = vmatpush1.bf16.msra.mxu1 (!%p2357_p6), %v2719_v47  ;;  %v2791_v46 = vld [vmem:[#allocation9 + $0x304] ss:$8 sps:$4 sm:$0xff] (!%p2357_p6)   ;;  %v2786_v47 = vld [vmem:[#allocation9 + $0x100] ss:$8 sps:$4 sm:$0xff] (!%p2357_p6)  }
  0xd7   : > { %1339 = vmatprep.subr.bf16.mxu0 (!%p2357_p6), %v2720_v48  ;;  %1805 = vmatprep.subr.bf16.mxu1 (!%p2357_p6), %v2722_v49 }
  0xda   : > { %1340 = vmatpush1.bf16.msra.mxu0 (!%p2357_p6), %v2724_v50  ;;  %1806 = vmatpush1.bf16.msra.mxu1 (!%p2357_p6), %v2725_v51  ;;  %v2789_v50 = vld [vmem:[#allocation9 + $0x300] ss:$8 sps:$4 sm:$0xff] (!%p2357_p6)   ;;  %v2794_v51 = vld [vmem:[#allocation9 + $0x114] ss:$8 sps:$4 sm:$0xff] (!%p2357_p6)  }
  0xdb   : > { %1341 = vmatprep.subr.bf16.mxu0 (!%p2357_p6), %v2726_v52  ;;  %1807 = vmatprep.subr.bf16.mxu1 (!%p2357_p6), %v2728_v53  ;;  %v2797_v52 = vld [vmem:[#allocation9 + $0x314] ss:$8 sps:$4 sm:$0xff] (!%p2357_p6)   ;;  %v2792_v53 = vld [vmem:[#allocation9 + $0x110] ss:$8 sps:$4 sm:$0xff] (!%p2357_p6)  }
  0xde   : > { %1342 = vmatpush1.bf16.msra.mxu0 (!%p2357_p6), %v2730_v54  ;;  %1808 = vmatpush1.bf16.msra.mxu1 (!%p2357_p6), %v2731_v55  ;;  %v2795_v54 = vld [vmem:[#allocation9 + $0x310] ss:$8 sps:$4 sm:$0xff] (!%p2357_p6)   ;;  %v2800_v55 = vld [vmem:[#allocation9 + $0x124] ss:$8 sps:$4 sm:$0xff] (!%p2357_p6)  }
  0xdf   : > { %1343 = vmatprep.subr.bf16.mxu0 (!%p2357_p6), %v2732_v56  ;;  %1809 = vmatprep.subr.bf16.mxu1 (!%p2357_p6), %v2734_v57  ;;  %v2803_v56 = vld [vmem:[#allocation9 + $0x324] ss:$8 sps:$4 sm:$0xff] (!%p2357_p6)   ;;  %v2798_v57 = vld [vmem:[#allocation9 + $0x120] ss:$8 sps:$4 sm:$0xff] (!%p2357_p6)  }
  0xe2   : > { %1344 = vmatpush1.bf16.msra.mxu0 (!%p2357_p6), %v2736_v58  ;;  %1810 = vmatpush1.bf16.msra.mxu1 (!%p2357_p6), %v2737_v59  ;;  %v2801_v58 = vld [vmem:[#allocation9 + $0x320] ss:$8 sps:$4 sm:$0xff] (!%p2357_p6)   ;;  %v2806_v59 = vld [vmem:[#allocation9 + $0x134] ss:$8 sps:$4 sm:$0xff] (!%p2357_p6)  }
  0xe3   : > { %1345 = vmatprep.subr.bf16.mxu0 (!%p2357_p6), %v2738_v60  ;;  %1811 = vmatprep.subr.bf16.mxu1 (!%p2357_p6), %v2740_v61  ;;  %v2809_v60 = vld [vmem:[#allocation9 + $0x334] ss:$8 sps:$4 sm:$0xff] (!%p2357_p6)   ;;  %v2804_v61 = vld [vmem:[#allocation9 + $0x130] ss:$8 sps:$4 sm:$0xff] (!%p2357_p6)  }
  0xe6   : > { %1346 = vmatpush1.bf16.msra.mxu0 (!%p2357_p6), %v2742_v62  ;;  %1812 = vmatpush1.bf16.msra.mxu1 (!%p2357_p6), %v2743_v63  ;;  %v2807_v62 = vld [vmem:[#allocation9 + $0x330] ss:$8 sps:$4 sm:$0xff] (!%p2357_p6)   ;;  %v2812_v63 = vld [vmem:[#allocation9 + $0x144] ss:$8 sps:$4 sm:$0xff] (!%p2357_p6)  }
  0xe7   : > { %1347 = vmatprep.subr.bf16.mxu0 (!%p2357_p6), %v2744_v0  ;;  %1813 = vmatprep.subr.bf16.mxu1 (!%p2357_p6), %v2746_v2  ;;  %v2815_v0 = vld [vmem:[#allocation9 + $0x344] ss:$8 sps:$4 sm:$0xff] (!%p2357_p6)   ;;  %v2810_v2 = vld [vmem:[#allocation9 + $0x140] ss:$8 sps:$4 sm:$0xff] (!%p2357_p6)  }
  0xea   : > { %1348 = vmatpush1.bf16.msra.mxu0 (!%p2357_p6), %v2748_v3  ;;  %v2813_v3 = vld [vmem:[#allocation9 + $0x340] ss:$8 sps:$4 sm:$0xff] (!%p2357_p6)  }
 0x198   : > { %v815_v8 = vpop.f32.mrb[0].mxu0  ;;  %v858_v9 = vpop.f32.mrb[0].mxu1  ;;  %886 = sbr.rel (%p2357_p6) target bundleno = 905 (0x389), region = 68 }
 0x199   : > { %v867_v12 = vadd.f32 %v815_v8, %v377_v4  ;;  %v869_v13 = vadd.f32 %v858_v9, %v379_v5  ;;  %v817_v14 = vpop.f32.mrb[1].mxu0  ;;  %v860_v15 = vpop.f32.mrb[1].mxu1  ;;  %v2749_v4 = vld [vmem:[#allocation9 + $0x290] ss:$8 sps:$4 sm:$0xff] (!%p2357_p6)   ;;  %v2750_v5 = vld [vmem:[#allocation9 + $0xa4] ss:$8 sps:$4 sm:$0xff] (!%p2357_p6)  }
 0x19a   : > { %v868_v18 = vadd.f32 %v817_v14, %v378_v6  ;;  %v870_v19 = vadd.f32 %v860_v15, %v380_v7  ;;  %v819_v20 = vpop.f32.mrb[2].mxu0  ;;  %v862_v21 = vpop.f32.mrb[2].mxu1  ;;  %v3375_v6 = vshrl.u32 (!%p2357_p6), %v897_v1, 7  ;;  %v2752_v7 = vld [vmem:[#allocation9 + $0x2a4] ss:$8 sps:$4 sm:$0xff] (!%p2357_p6)   ;;  %1814 = vmatpush1.bf16.msra.mxu1 (!%p2357_p6), %v2749_v4  ;;  %1349 = vmatprep.subr.bf16.mxu0 (!%p2357_p6), %v2750_v5 }
 0x19b   : > { %875 = vst [vmem:[#allocation2] sm:$0xff] %v867_v12  ;;  %877 = vst [vmem:[#allocation2 + $0x10] sm:$0xff] %v869_v13  ;;  %v871_v22 = vadd.f32 %v819_v20, %v381_v10  ;;  %v873_v23 = vadd.f32 %v862_v21, %v383_v11  ;;  %v821_v24 = vpop.f32.mrb[3].mxu0  ;;  %v864_v25 = vpop.f32.mrb[3].mxu1  ;;  %v2754_v8 = vld [vmem:[#allocation9 + $0xa0] ss:$8 sps:$4 sm:$0xff] (!%p2357_p6)   ;;  %1815 = vmatprep.subr.bf16.mxu1 (!%p2357_p6), %v2752_v7 }
 0x19c   : > { %876 = vst [vmem:[#allocation2 + $0x8] sm:$0xff] %v868_v18  ;;  %878 = vst [vmem:[#allocation2 + $0x18] sm:$0xff] %v870_v19  ;;  %v872_v26 = vadd.f32 %v821_v24, %v382_v16  ;;  %v874_v27 = vadd.f32 %v864_v25, %v384_v17  ;;  %v2755_v9 = vld [vmem:[#allocation9 + $0x2a0] ss:$8 sps:$4 sm:$0xff] (!%p2357_p6)   ;;  %v2756_v10 = vld [vmem:[#allocation9 + $0xb4] ss:$8 sps:$4 sm:$0xff] (!%p2357_p6)   ;;  %1350 = vmatpush1.bf16.msra.mxu0 (!%p2357_p6), %v2754_v8 }
 0x19d   : > { %879 = vst [vmem:[#allocation2 + $0x20] sm:$0xff] %v871_v22  ;;  %881 = vst [vmem:[#allocation2 + $0x30] sm:$0xff] %v873_v23  ;;  %v3378_v11 = vsub.s32 (!%p2357_p6), 1, %v3375_v6  ;;  %v2758_v12 = vld [vmem:[#allocation9 + $0x2b4] ss:$8 sps:$4 sm:$0xff] (!%p2357_p6)   ;;  %1351 = vmatprep.subr.bf16.mxu0 (!%p2357_p6), %v2756_v10  ;;  %v3388_v30 = vsub.s32 (!%p2357_p6), 0, %v3375_v6 }
 0x19e   : > { %880 = vst [vmem:[#allocation2 + $0x28] sm:$0xff] %v872_v26  ;;  %882 = vst [vmem:[#allocation2 + $0x38] sm:$0xff] %v874_v27  ;;  %v2760_v13 = vld [vmem:[#allocation9 + $0xb0] ss:$8 sps:$4 sm:$0xff] (!%p2357_p6)   ;;  %v3383_v15 = vld [vmem:[%s3508_s2] sm:$0xf] (!%p2357_p6)  ;;  %1816 = vmatpush1.bf16.msra.mxu1 (!%p2357_p6), %v2755_v9 }
 0x19f   : > { %v2761_v16 = vld [vmem:[#allocation9 + $0x2b0] ss:$8 sps:$4 sm:$0xff]   ;;  %v2762_v17 = vld [vmem:[#allocation9 + $0xc4] ss:$8 sps:$4 sm:$0xff]   ;;  %v904_v18 = vrot.slane %v3383_v15, %v3378_v11  ;;  %1817 = vmatprep.subr.bf16.mxu1 %v2758_v12  ;;  %v2766_v23 = vld [vmem:[#allocation9 + $0xc0] ss:$8 sps:$4 sm:$0xff]   ;;  %v900_v37 = vrot.slane %v3383_v15, %v3388_v30 }
 0x1a0   : > { %v2764_v20 = vld [vmem:[#allocation9 + $0x2c4] ss:$8 sps:$4 sm:$0xff]   ;;  %1352 = vmatpush1.bf16.msra.mxu0 %v2760_v13  ;;  %v2767_v24 = vld [vmem:[#allocation9 + $0x2c0] ss:$8 sps:$4 sm:$0xff]   ;;  %v2768_v27 = vld [vmem:[#allocation9 + $0xd4] ss:$8 sps:$4 sm:$0xff]  }
 0x1a1   : > { %1353 = vmatprep.subr.bf16.mxu0 %v2762_v17  ;;  %v911_v4 = vsub.s32 3, %v3375_v6  ;;  %v2818_v5 = vld [vmem:[#allocation9 + $0x154] ss:$8 sps:$4 sm:$0xff]   ;;  %v2816_v8 = vld [vmem:[#allocation9 + $0x150] ss:$8 sps:$4 sm:$0xff]  }
 0x1a2   : > { %1818 = vmatpush1.bf16.msra.mxu1 %v2761_v16  ;;  %v887_v36 = vld [vmem:[#allocation2] sm:$0xff]  ;;  %v2819_v9 = vld [vmem:[#allocation9 + $0x350] ss:$8 sps:$4 sm:$0xff]  }
 0x1a3   : > { %v888_v14 = vld [vmem:[#allocation2 + $0x8] sm:$0xff]  ;;  %1819 = vmatprep.subr.bf16.mxu1 %v2764_v20  ;;  %v917_v42 = vadd.f32 %v900_v37, %v887_v36  ;;  %v2821_v7 = vld [vmem:[#allocation9 + $0x354] ss:$8 sps:$4 sm:$0xff]   ;;  %v912_v10 = vrot.slane %v3383_v15, %v911_v4 }
 0x1a4   : > { %v918_v21 = vadd.f32 %v904_v18, %v888_v14  ;;  %1354 = vmatpush1.bf16.msra.mxu0 %v2766_v23  ;;  %v891_v38 = vld [vmem:[#allocation2 + $0x20] sm:$0xff]  ;;  %v890_v14 = vld [vmem:[#allocation2 + $0x18] sm:$0xff] }
 0x1a5   : > { %v892_v19 = vld [vmem:[#allocation2 + $0x28] sm:$0xff]  ;;  %1355 = vmatprep.subr.bf16.mxu0 %v2768_v27  ;;  %v921_v43 = vadd.f32 %v900_v37, %v891_v38  ;;  %v925_v48 = vpack.c.bf16 %v917_v42, %v917_v42  ;;  %v894_v16 = vld [vmem:[#allocation2 + $0x38] sm:$0xff] }
 0x1a6   : > { %v922_v22 = vadd.f32 %v904_v18, %v892_v19  ;;  %v926_v25 = vpack.c.bf16 %v918_v21, %v918_v21  ;;  %1820 = vmatpush1.bf16.msra.mxu1 %v2767_v24  ;;  %v2824_v12 = vld [vmem:[#allocation9 + $0x164] ss:$8 sps:$4 sm:$0xff]   ;;  %v2822_v17 = vld [vmem:[#allocation9 + $0x160] ss:$8 sps:$4 sm:$0xff]   ;;  %v920_v19 = vadd.f32 %v912_v10, %v890_v14  ;;  %v924_v20 = vadd.f32 %v912_v10, %v894_v16  ;;  %v2830_v21 = vld [vmem:[#allocation9 + $0x174] ss:$8 sps:$4 sm:$0xff]  }
 0x1a7   : > { %1821 = vmatprep.subr.bf16.mxu1 %v2770_v28  ;;  %v929_v49 = vpack.c.bf16 %v921_v43, %v921_v43  ;;  %v2827_v13 = vld [vmem:[#allocation9 + $0x364] ss:$8 sps:$4 sm:$0xff]   ;;  %v2825_v18 = vld [vmem:[#allocation9 + $0x360] ss:$8 sps:$4 sm:$0xff]   ;;  %v2852_v42 = vld [vmem:[#allocation9 + $0x1b0] ss:$8 sps:$4 sm:$0xff]  }
 0x1a8   : > { %v930_v26 = vpack.c.bf16 %v922_v22, %v922_v22  ;;  %1361 = vmatprep.mubr.bf16.mxu0 %v926_v25  ;;  %1356 = vmatpush1.bf16.msra.mxu0 %v2772_v29  ;;  %v2833_v22 = vld [vmem:[#allocation9 + $0x374] ss:$8 sps:$4 sm:$0xff]   ;;  %v928_v23 = vpack.c.bf16 %v920_v19, %v920_v19  ;;  %v932_v24 = vpack.c.bf16 %v924_v20, %v924_v20  ;;  %v2828_v25 = vld [vmem:[#allocation9 + $0x170] ss:$8 sps:$4 sm:$0xff]   ;;  %v2836_v27 = vld [vmem:[#allocation9 + $0x184] ss:$8 sps:$4 sm:$0xff]  }
 0x1a9   : > { %1357 = vmatprep.subr.bf16.mxu0 %v2774_v32  ;;  %v2839_v28 = vld [vmem:[#allocation9 + $0x384] ss:$8 sps:$4 sm:$0xff]   ;;  %v2834_v29 = vld [vmem:[#allocation9 + $0x180] ss:$8 sps:$4 sm:$0xff]   ;;  %v2842_v32 = vld [vmem:[#allocation9 + $0x194] ss:$8 sps:$4 sm:$0xff]  }
 0x1aa   : > { %1827 = vmatprep.mubr.bf16.mxu1 %v930_v26  ;;  %1822 = vmatpush1.bf16.msra.mxu1 %v2773_v31  ;;  %v2831_v26 = vld [vmem:[#allocation9 + $0x370] ss:$8 sps:$4 sm:$0xff]   ;;  %v2837_v31 = vld [vmem:[#allocation9 + $0x380] ss:$8 sps:$4 sm:$0xff]   ;;  %v2848_v36 = vld [vmem:[#allocation9 + $0x1a4] ss:$8 sps:$4 sm:$0xff]  }
 0x1ab   : > { %1823 = vmatprep.subr.bf16.mxu1 %v2776_v33  ;;  %v2845_v33 = vld [vmem:[#allocation9 + $0x394] ss:$8 sps:$4 sm:$0xff]   ;;  %v2851_v37 = vld [vmem:[#allocation9 + $0x3a4] ss:$8 sps:$4 sm:$0xff]   ;;  %v2846_v38 = vld [vmem:[#allocation9 + $0x1a0] ss:$8 sps:$4 sm:$0xff]  }
 0x1ac   : > { %1358 = vmatpush1.bf16.msra.mxu0 %v2778_v34  ;;  %v2840_v34 = vld [vmem:[#allocation9 + $0x190] ss:$8 sps:$4 sm:$0xff]  }
 0x1ad   : > { %1359 = vmatprep.subr.bf16.mxu0 %v2780_v39  ;;  %v2849_v39 = vld [vmem:[#allocation9 + $0x3a0] ss:$8 sps:$4 sm:$0xff]   ;;  %v2855_v43 = vld [vmem:[#allocation9 + $0x3b0] ss:$8 sps:$4 sm:$0xff]  }
 0x1ae   : > { %1824 = vmatpush1.bf16.msra.mxu1 %v2779_v35  ;;  %v2843_v35 = vld [vmem:[#allocation9 + $0x390] ss:$8 sps:$4 sm:$0xff]  }
 0x1af   : > { %1825 = vmatprep.subr.bf16.mxu1 %v2782_v40  ;;  %v2854_v40 = vld [vmem:[#allocation9 + $0x1b4] ss:$8 sps:$4 sm:$0xff]  }
 0x1b0   : > { %1360 = vmatpush1.bf16.msra.mxu0 %v2784_v41  ;;  %v2857_v41 = vld [vmem:[#allocation9 + $0x3b4] ss:$8 sps:$4 sm:$0xff]  }
 0x1b1   : > { %1370 = vmatprep.subr.bf16.mxu0 %v2788_v45  ;;  %v2863_v45 = vld [vmem:[#allocation9 + $0x3c4] ss:$8 sps:$4 sm:$0xff]  }
 0x1b2   : > { %1826 = vmatpush1.bf16.msra.mxu1 %v2785_v44  ;;  %v2860_v44 = vld [vmem:[#allocation9 + $0x1c4] ss:$8 sps:$4 sm:$0xff]  }
 0x1b3   : > { %1836 = vmatprep.subr.bf16.mxu1 %v2791_v46  ;;  %1362 = vmatmul.mubr.bf16.vlgmr.msra.gmra.mrb[0].mxu0 %v925_v48  ;;  %v2858_v46 = vld [vmem:[#allocation9 + $0x1c0] ss:$8 sps:$4 sm:$0xff]   ;;  %v2866_v48 = vld [vmem:[#allocation9 + $0x1d4] ss:$8 sps:$4 sm:$0xff]  }
 0x1b4   : > { %1371 = vmatpush1.bf16.msra.mxu0 %v2786_v47  ;;  %1402 = vmatprep.mubr.bf16.mxu0 %v928_v23  ;;  %v2861_v47 = vld [vmem:[#allocation9 + $0x3c0] ss:$8 sps:$4 sm:$0xff]  }
 0x1b5   : > { %1828 = vmatmul.mubr.bf16.vlgmr.msra.gmra.mrb[0].mxu1 %v929_v49  ;;  %1372 = vmatprep.subr.bf16.mxu0 %v2794_v51  ;;  %v2869_v49 = vld [vmem:[#allocation9 + $0x3d4] ss:$8 sps:$4 sm:$0xff]   ;;  %v2864_v51 = vld [vmem:[#allocation9 + $0x1d0] ss:$8 sps:$4 sm:$0xff]  }
 0x1b6   : > { %1837 = vmatpush1.bf16.msra.mxu1 %v2789_v50  ;;  %1868 = vmatprep.mubr.bf16.mxu1 %v932_v24  ;;  %v907_v50 = vsub.s32 2, %v3375_v6 }
 0x1b7   : > { %1838 = vmatprep.subr.bf16.mxu1 %v2797_v52  ;;  %v2867_v52 = vld [vmem:[#allocation9 + $0x3d0] ss:$8 sps:$4 sm:$0xff]  }
 0x1b8   : > { %1373 = vmatpush1.bf16.msra.mxu0 %v2792_v53  ;;  %v2872_v53 = vld [vmem:[#allocation9 + $0x1e4] ss:$8 sps:$4 sm:$0xff]  }
 0x1b9   : > { %1374 = vmatprep.subr.bf16.mxu0 %v2800_v55  ;;  %v2870_v55 = vld [vmem:[#allocation9 + $0x1e0] ss:$8 sps:$4 sm:$0xff]  }
 0x1ba   : > { %1839 = vmatpush1.bf16.msra.mxu1 %v2795_v54  ;;  %v2875_v54 = vld [vmem:[#allocation9 + $0x3e4] ss:$8 sps:$4 sm:$0xff]  }
 0x1bb   : > { %1840 = vmatprep.subr.bf16.mxu1 %v2803_v56  ;;  %v908_v56 = vrot.slane %v3383_v15, %v907_v50  ;;  %v3069_v15 = vmov 0  }
 0x1bc   : > { %1375 = vmatpush1.bf16.msra.mxu0 %v2798_v57  ;;  %v2873_v57 = vld [vmem:[#allocation9 + $0x3e0] ss:$8 sps:$4 sm:$0xff]   ;;  %2689 = vset.pattern.permute.xlu0 %v3069_v15 }
 0x1bd   : > { %1376 = vmatprep.subr.bf16.mxu0 %v2806_v59  ;;  %v893_v59 = vld [vmem:[#allocation2 + $0x30] sm:$0xff] }
 0x1be   : > { %1841 = vmatpush1.bf16.msra.mxu1 %v2801_v58  ;;  %v889_v58 = vld [vmem:[#allocation2 + $0x10] sm:$0xff] }
 0x1bf   : > { %1842 = vmatprep.subr.bf16.mxu1 %v2809_v60  ;;  %v2878_v60 = vld [vmem:[#allocation9 + $0x1f4] ss:$8 sps:$4 sm:$0xff]  }
 0x1c0   : > { %1377 = vmatpush1.bf16.msra.mxu0 %v2804_v61  ;;  %v2881_v61 = vld [vmem:[#allocation9 + $0x3f4] ss:$8 sps:$4 sm:$0xff]  }
 0x1c1   : > { %1378 = vmatprep.subr.bf16.mxu0 %v2812_v63  ;;  %v923_v63 = vadd.f32 %v908_v56, %v893_v59 }
 0x1c2   : > { %1843 = vmatpush1.bf16.msra.mxu1 %v2807_v62  ;;  %v919_v62 = vadd.f32 %v908_v56, %v889_v58 }
 0x1c3   : > { %1844 = vmatprep.subr.bf16.mxu1 %v2815_v0  ;;  %v2876_v0 = vld [vmem:[#allocation9 + $0x1f0] ss:$8 sps:$4 sm:$0xff]   ;;  %v931_v4 = vpack.c.bf16 %v923_v63, %v923_v63 }
 0x1c4   : > { %1379 = vmatpush1.bf16.msra.mxu0 %v2810_v2  ;;  %v2879_v2 = vld [vmem:[#allocation9 + $0x3f0] ss:$8 sps:$4 sm:$0xff]  }
 0x1c5   : > { %1380 = vmatprep.subr.bf16.mxu0 %v2818_v5  ;;  %v3070_v5 = vmov 1966171168  }
 0x1c6   : > { %1845 = vmatpush1.bf16.msra.mxu1 %v2813_v3  ;;  %v927_v3 = vpack.c.bf16 %v919_v62, %v919_v62 }
 0x1c7   : > { %1846 = vmatprep.subr.bf16.mxu1 %v2821_v7  ;;  %v1882_v7 = vunpack.c.l.s4 %v3070_v5 }
 0x1c8   : > { %1381 = vmatpush1.bf16.msra.mxu0 %v2816_v8 }
 0x1c9   : > { %1382 = vmatprep.subr.bf16.mxu0 %v2824_v12  ;;  %v1883_v8 = vunpack.c.0.s8 %v1882_v7 }
 0x1ca   : > { %1847 = vmatpush1.bf16.msra.mxu1 %v2819_v9  ;;  %v997_v9 = vld [vmem:[%s3510_s4] sm:$0x3] }
 0x1cb   : > { %1848 = vmatprep.subr.bf16.mxu1 %v2827_v13  ;;  %v1886_v13 = vsub.s32 %v1883_v8, %v3375_v6 }
 0x1cc   : > { %1383 = vmatpush1.bf16.msra.mxu0 %v2822_v17 }
 0x1cd   : > { %1384 = vmatprep.subr.bf16.mxu0 %v2830_v21  ;;  %v1002_v21 = vrot.slane %v997_v9, %v3388_v30 }
 0x1ce   : > { %1849 = vmatpush1.bf16.msra.mxu1 %v2825_v18 }
 0x1cf   : > { %1850 = vmatprep.subr.bf16.mxu1 %v2833_v22  ;;  %v1006_v22 = vrot.slane %v997_v9, %v3378_v11 }
 0x1d0   : > { %1385 = vmatpush1.bf16.msra.mxu0 %v2828_v25 }
 0x1d1   : > { %1386 = vmatprep.subr.bf16.mxu0 %v2836_v27  ;;  %v2041_v27 = vld [vmem:[%s3511_s5] sm:$0x3] }
 0x1d2   : > { %1851 = vmatpush1.bf16.msra.mxu1 %v2831_v26 }
 0x1d3   : > { %1852 = vmatprep.subr.bf16.mxu1 %v2839_v28 }
 0x1d4   : > { %1387 = vmatpush1.bf16.msra.mxu0 %v2834_v29 }
 0x1d5   : > { %1388 = vmatprep.subr.bf16.mxu0 %v2842_v32 }
 0x1d6   : > { %1853 = vmatpush1.bf16.msra.mxu1 %v2837_v31 }
 0x1d7   : > { %1854 = vmatprep.subr.bf16.mxu1 %v2845_v33 }
 0x1d8   : > { %1389 = vmatpush1.bf16.msra.mxu0 %v2840_v34 }
 0x1d9   : > { %1390 = vmatprep.subr.bf16.mxu0 %v2848_v36  ;;  %v3413_v36 = vrot.slane %v2041_v27, %v3378_v11 }
 0x1da   : > { %1855 = vmatpush1.bf16.msra.mxu1 %v2843_v35  ;;  %v3410_v35 = vrot.slane %v2041_v27, %v3388_v30 }
 0x1db   : > { %1856 = vmatprep.subr.bf16.mxu1 %v2851_v37 }
 0x1dc   : > { %1391 = vmatpush1.bf16.msra.mxu0 %v2846_v38 }
 0x1dd   : > { %1392 = vmatprep.subr.bf16.mxu0 %v2854_v40 }
 0x1de   : > { %1857 = vmatpush1.bf16.msra.mxu1 %v2849_v39 }
 0x1df   : > { %1858 = vmatprep.subr.bf16.mxu1 %v2857_v41 }
 0x1e0   : > { %1393 = vmatpush1.bf16.msra.mxu0 %v2852_v42 }
 0x1e1   : > { %1394 = vmatprep.subr.bf16.mxu0 %v2860_v44 }
 0x1e2   : > { %1859 = vmatpush1.bf16.msra.mxu1 %v2855_v43 }
 0x1e3   : > { %1860 = vmatprep.subr.bf16.mxu1 %v2863_v45 }
 0x1e4   : > { %1395 = vmatpush1.bf16.msra.mxu0 %v2858_v46 }
 0x1e5   : > { %1396 = vmatprep.subr.bf16.mxu0 %v2866_v48 }
 0x1e6   : > { %1861 = vmatpush1.bf16.msra.mxu1 %v2861_v47 }
 0x1e7   : > { %1862 = vmatprep.subr.bf16.mxu1 %v2869_v49 }
 0x1e8   : > { %1397 = vmatpush1.bf16.msra.mxu0 %v2864_v51 }
 0x1e9   : > { %1398 = vmatprep.subr.bf16.mxu0 %v2872_v53 }
 0x1ea   : > { %1863 = vmatpush1.bf16.msra.mxu1 %v2867_v52 }
 0x1eb   : > { %1864 = vmatprep.subr.bf16.mxu1 %v2875_v54 }
 0x1ec   : > { %1399 = vmatpush1.bf16.msra.mxu0 %v2870_v55 }
 0x1ed   : > { %1400 = vmatprep.subr.bf16.mxu0 %v2878_v60 }
 0x1ee   : > { %1865 = vmatpush1.bf16.msra.mxu1 %v2873_v57 }
 0x1ef   : > { %1866 = vmatprep.subr.bf16.mxu1 %v2881_v61 }
 0x1f0   : > { %1401 = vmatpush1.bf16.msra.mxu0 %v2876_v0 }
 0x1f2   : > { %1867 = vmatpush1.bf16.msra.mxu1 %v2879_v2 }
 0x1f3   : > { %1403 = vmatmul.mubr.bf16.vlgmr.msra.gmra.mrb[0].mxu0 %v927_v3 }
 0x1f5   : > { %1869 = vmatmul.mubr.bf16.vlgmr.msra.gmra.mrb[0].mxu1 %v931_v4 }
 0x2c6   : > { %v1404_v10 = vpop.f32.mrb[0].mxu0 }
 0x2c7   : > { %v1406_v14 = vpop.f32.mrb[1].mxu0  ;;  %v3405_v33 = vadd.f32 %v1404_v10, %v1002_v21 }
 0x2c8   : > { %v1870_v12 = vpop.f32.mrb[0].mxu1  ;;  %v1408_v19 = vpop.f32.mrb[2].mxu0  ;;  %v3407_v34 = vadd.f32 %v1406_v14, %v1006_v22 }
 0x2c9   : > { %v1872_v16 = vpop.f32.mrb[1].mxu1  ;;  %v1409_v23 = vpop.f32.mrb[3].mxu0 }
 0x2ca   : > { %v1879_v17 = vcombine.low %v1870_v12, %v1872_v16  ;;  %v1880_v18 = vcombine.high %v1870_v12, %v1872_v16  ;;  %v1874_v20 = vpop.f32.mrb[2].mxu1 }
 0x2cb   : > { %v1875_v24 = vpop.f32.mrb[3].mxu1 }
 0x2cc   : > { %v1887_v25 = vrot.slane %v1879_v17, %v1886_v13  ;;  %v1894_v26 = vrot.slane %v1880_v18, %v1886_v13 }
 0x2ce   : > { %v1895_v28 = vcombine.high %v1887_v25, %v1887_v25  ;;  %v1896_v29 = vcombine.high %v1894_v26, %v1894_v26  ;;  %v1903_v31 = vrot.slane %v1887_v25, %v1886_v13  ;;  %v1910_v32 = vrot.slane %v1894_v26, %v1886_v13 }
 0x2d0   : > { %v1917_v37 = vrot.slane %v1895_v28, %v1886_v13  ;;  %v1924_v38 = vrot.slane %v1896_v29, %v1886_v13  ;;  %v1932_v39 = vrot.slane %v1903_v31, %v3388_v30  ;;  %v1936_v40 = vrot.slane %v1903_v31, %v3378_v11 }
 0x2d1   : > { %v1925_v41 = vcombine.high %v1903_v31, %v1903_v31  ;;  %v1964_v42 = vrot.slane %v1910_v32, %v3388_v30  ;;  %v1968_v43 = vrot.slane %v1910_v32, %v3378_v11  ;;  %v1926_v44 = vcombine.high %v1910_v32, %v1910_v32 }
 0x2d2   : > { %v2009_v45 = vadd.f32 %v3405_v33, %v1932_v39  ;;  %v2010_v46 = vadd.f32 %v3407_v34, %v1936_v40  ;;  %v1972_v47 = vrot.slane %v1924_v38, %v3388_v30  ;;  %v1976_v48 = vrot.slane %v1924_v38, %v3378_v11 }
 0x2d3   : > { %v1948_v49 = vrot.slane %v1925_v41, %v3388_v30  ;;  %v1952_v50 = vrot.slane %v1925_v41, %v3378_v11  ;;  %v2017_v51 = vadd.f32 %v3405_v33, %v1964_v42  ;;  %v2018_v52 = vadd.f32 %v3407_v34, %v1968_v43 }
 0x2d4   : > { %v2025_v53 = vmax.f32 %v2009_v45, 0.0  ;;  %v2026_v54 = vmax.f32 %v2010_v46, 0.0  ;;  %v2019_v55 = vadd.f32 %v3405_v33, %v1972_v47  ;;  %v2020_v56 = vadd.f32 %v3407_v34, %v1976_v48 }
 0x2d5   : > { %v2013_v57 = vadd.f32 %v3405_v33, %v1948_v49  ;;  %v2014_v58 = vadd.f32 %v3407_v34, %v1952_v50  ;;  %v2033_v59 = vmax.f32 %v2017_v51, 0.0  ;;  %v2034_v60 = vmax.f32 %v2018_v52, 0.0 }
 0x2d6   : > { %v2053_v61 = vmul.f32 %v3410_v35, %v2025_v53  ;;  %v2054_v62 = vmul.f32 %v3413_v36, %v2026_v54  ;;  %v2035_v63 = vmax.f32 %v2019_v55, 0.0  ;;  %v2036_v0 = vmax.f32 %v2020_v56, 0.0  ;;  %v2486_v55 = vld [vmem:[#allocation3] ss:$0 sm:$0xff] }
 0x2d7   : > { %v2029_v2 = vmax.f32 %v2013_v57, 0.0  ;;  %v2030_v3 = vmax.f32 %v2014_v58, 0.0  ;;  %v2061_v4 = vmul.f32 %v3410_v35, %v2033_v59  ;;  %v2062_v15 = vmul.f32 %v3413_v36, %v2034_v60 }
 0x2d8   : > { %v2069_v5 = vadd.f32 %v2054_v62, %v2053_v61  ;;  %v2063_v7 = vmul.f32 %v3410_v35, %v2035_v63  ;;  %v2064_v8 = vmul.f32 %v3413_v36, %v2036_v0  ;;  %v1940_v9 = vrot.slane %v1917_v37, %v3388_v30 }
 0x2d9   : > { %v2057_v10 = vmul.f32 %v3410_v35, %v2029_v2  ;;  %v2058_v12 = vmul.f32 %v3413_v36, %v2030_v3  ;;  %v2081_v13 = vadd.f32 %v2062_v15, %v2061_v4  ;;  %v1944_v14 = vrot.slane %v1917_v37, %v3378_v11 }
 0x2da   : > { %2070 = vadd.xlane.f32.xlu0 %v2069_v5  ;;  %v2084_v16 = vadd.f32 %v2064_v8, %v2063_v7  ;;  %v2011_v17 = vadd.f32 %v3405_v33, %v1940_v9  ;;  %v1927_v18 = vcombine.high %v1917_v37, %v1917_v37  ;;  %v1980_v19 = vrot.slane %v1926_v44, %v3388_v30 }
 0x2db   : > { %v2075_v20 = vadd.f32 %v2058_v12, %v2057_v10  ;;  %v2012_v21 = vadd.f32 %v3407_v34, %v1944_v14  ;;  %v1984_v22 = vrot.slane %v1926_v44, %v3378_v11  ;;  %v1928_v23 = vcombine.high %v1924_v38, %v1924_v38 }
 0x2dc   : > { %v2027_v24 = vmax.f32 %v2011_v17, 0.0  ;;  %v1956_v25 = vrot.slane %v1927_v18, %v3388_v30  ;;  %v1960_v26 = vrot.slane %v1927_v18, %v3378_v11  ;;  %v2021_v27 = vadd.f32 %v3405_v33, %v1980_v19 }
 0x2dd   : > { %2076 = vadd.xlane.f32.xlu1 %v2075_v20  ;;  %v2028_v28 = vmax.f32 %v2012_v21, 0.0  ;;  %v2022_v29 = vadd.f32 %v3407_v34, %v1984_v22  ;;  %v1988_v31 = vrot.slane %v1928_v23, %v3388_v30  ;;  %v1992_v32 = vrot.slane %v1928_v23, %v3378_v11 }
 0x2de   : > { %2082 = vadd.xlane.f32.xlu0 %v2081_v13  ;;  %v2055_v37 = vmul.f32 %v3410_v35, %v2027_v24  ;;  %v2015_v38 = vadd.f32 %v3405_v33, %v1956_v25  ;;  %v2016_v39 = vadd.f32 %v3407_v34, %v1960_v26  ;;  %v2037_v40 = vmax.f32 %v2021_v27, 0.0 }
 0x2df   : > { %v2056_v41 = vmul.f32 %v3413_v36, %v2028_v28  ;;  %v2038_v42 = vmax.f32 %v2022_v29, 0.0  ;;  %v2023_v43 = vadd.f32 %v3405_v33, %v1988_v31  ;;  %v2024_v44 = vadd.f32 %v3407_v34, %v1992_v32 }
 0x2e0   : > { %v2031_v45 = vmax.f32 %v2015_v38, 0.0  ;;  %v2032_v46 = vmax.f32 %v2016_v39, 0.0  ;;  %v2065_v30 = vmul.f32 %v3410_v35, %v2037_v40  ;;  %v2120_v61 = vand.u32 127, %v897_v1 }
 0x2e1   : > { %2085 = vadd.xlane.f32.xlu1 %v2084_v16  ;;  %v2072_v11 = vadd.f32 %v2056_v41, %v2055_v37  ;;  %v2066_v47 = vmul.f32 %v3413_v36, %v2038_v42  ;;  %v2039_v48 = vmax.f32 %v2023_v43, 0.0  ;;  %v2040_v49 = vmax.f32 %v2024_v44, 0.0 }
 0x2e2   : > { %v2059_v50 = vmul.f32 %v3410_v35, %v2031_v45  ;;  %v2060_v51 = vmul.f32 %v3413_v36, %v2032_v46 }
 0x2e3   : > { %2073 = vadd.xlane.f32.xlu0 %v2072_v11  ;;  %v2087_v52 = vadd.f32 %v2066_v47, %v2065_v30  ;;  %v2067_v33 = vmul.f32 %v3410_v35, %v2039_v48  ;;  %v2068_v34 = vmul.f32 %v3413_v36, %v2040_v49  ;;  %v2123_v35 = vsub.s32 %v2120_v61, %v3375_v6 }
 0x2e4   : > { %v2078_v53 = vadd.f32 %v2060_v51, %v2059_v50 }
 0x2e5   : > { %v2090_v54 = vadd.f32 %v2068_v34, %v2067_v33 }
 0x2e6   : > { %2079 = vadd.xlane.f32.xlu1 %v2078_v53 }
 0x2e7   : > { %2088 = vadd.xlane.f32.xlu0 %v2087_v52 }
 0x2ea   : > { %2091 = vadd.xlane.f32.xlu1 %v2090_v54 }
 0x2fd   : > { %2100 = vperm.xlu0 %2689, %v2486_v55  }
 0x367   : > { %v2071_v56 = vpop.xlane.xlu0 %2070 }
 0x36a   : > { %v2077_v58 = vpop.xlane.xlu1 %2076 }
 0x36b   : > { %v2083_v57 = vpop.xlane.xlu0 %2082 }
 0x36e   : > { %v2086_v60 = vpop.xlane.xlu1 %2085 }
 0x370   : > { %v2074_v59 = vpop.xlane.xlu0 %2073 }
 0x373   : > { %v2080_v63 = vpop.xlane.xlu1 %2079 }
 0x374   : > { %v2089_v62 = vpop.xlane.xlu0 %2088 }
 0x377   : > { %v2092_v10 = vpop.xlane.xlu1 %2091 }
 0x37c   : > { %v2101_v0 = vpop.permute.xlu0 %2100 }
 0x37d   : > { %v2103_v36 = vadd.f32 %v2101_v0, %v2071_v56  ;;  %v2104_v2 = vadd.f32 %v2101_v0, %v2074_v59  ;;  %v2105_v3 = vadd.f32 %v2101_v0, %v2077_v58  ;;  %v2106_v4 = vadd.f32 %v2101_v0, %v2080_v63 }
 0x37e   : > { %v2107_v15 = vadd.f32 %v2101_v0, %v2083_v57  ;;  %v2108_v5 = vadd.f32 %v2101_v0, %v2086_v60  ;;  %v2109_v12 = vadd.f32 %v2101_v0, %v2089_v62  ;;  %v2110_v1 = vadd.f32 %v2101_v0, %v2092_v10 }
 0x37f   : > { %v2124_v7 = vrot.slane %v2103_v36, %v2123_v35  ;;  %v2128_v8 = vrot.slane %v2104_v2, %v2123_v35  ;;  %v2132_v9 = vrot.slane %v2105_v3, %v2123_v35  ;;  %v2136_v13 = vrot.slane %v2106_v4, %v2123_v35 }
 0x380   : > { %v2140_v6 = vrot.slane %v2107_v15, %v2123_v35  ;;  %v2144_v17 = vrot.slane %v2108_v5, %v2123_v35  ;;  %v2148_v19 = vrot.slane %v2109_v12, %v2123_v35  ;;  %v2152_v21 = vrot.slane %v2110_v1, %v2123_v35 }
 0x381   : > { %v2154_v14 = vsel %vm2153_vm0, %v2128_v8, %v2124_v7 }
 0x382   : > { %v2156_v16 = vsel %vm2155_vm1, %v2132_v9, %v2154_v14 }
 0x383   : > { %v2158_v18 = vsel %vm2157_vm2, %v2136_v13, %v2156_v16 }
 0x384   : > { %v2160_v20 = vsel %vm2159_vm3, %v2140_v6, %v2158_v18 }
 0x385   : > { %v2162_v22 = vsel %vm2161_vm4, %v2144_v17, %v2160_v20 }
 0x386   : > { %v2164_v23 = vsel %vm2163_vm5, %v2148_v19, %v2162_v22 }
 0x387   : > { %v2166_v24 = vsel %vm2165_vm6, %v2152_v21, %v2164_v23 }
 0x388   : > { %2169 = vst.msk [vmem:[#allocation10] sm:$0xff] %vm2168_vm7, %v2166_v24 }
 0x389 PF: > { %p2530_p8 = scmp.eq.s32.totalorder %s3144_s6, 2  ;;  %s3071_s26 = smov [#allocation10]  }
 0x38a   : > { %s2179_s3 = sshll.u32 %s3071_s26, 4  ;;  %s2180_s3 = int_to_ptr.vmem [resolvable:$true] %s2179_s3 }
 0x38b   : > { %s2970_s17 = scalar_lea.vmem %s2180_s3, 128  ;;  %p2977_p0 = scmp.lt.s32.totalorder %s2180_s3, %s2180_s3 }
 0x38c   : > { %p2971_p13 = scmp.ne.s32.totalorder %s2180_s3, %s2970_s17  ;;  %p2978_p4 = scmp.lt.s32.totalorder %s2970_s17, %s2970_s17 }
 0x38e   : > { %p2972_p1 = pnand %p2971_p13, %p2530_p8  ;;  %p2979_p7 = por %p2978_p4, %p2977_p0 }
 0x390   : > { %p2973_p2 = pneg %p2972_p1 }
 0x392   : > { %p2980_p9 = pnand %p2979_p7, %p2973_p2 }
 0x394   : > { %2983 = shalt.err (!%p2980_p9)
}
 0x395   : > { %s2984_s12 = scalar_lea.hbm %s3513_s7, 128 }
 0x396   : > { %p2985_p12 = scmp.ne.s32.totalorder %s3513_s7, %s2984_s12  ;;  %p2990_p10 = scmp.lt.u32.totalorder %s2984_s12, %s3513_s7 }
 0x398   : > { %p2986_p5 = pnand %p2985_p12, %p2530_p8 }
 0x39a   : > { %p2987_p11 = pneg %p2986_p5 }
 0x39c   : > { %p2992_p3 = pnand %p2990_p10, %p2987_p11 }
 0x39e   : > { %2995 = shalt.err (!%p2992_p3)
}
 0x39f   : > { %2513 = dma.vmem_to_hbm [thread:$0]  (%p2530_p8), %s2180_s3, 128, %s3513_s7, [#allocation6]  }
 0x3a0   : > { %3033 = dma.done.wait (%p2530_p8), [#allocation6], 128  }
 0x3a1   : > { %3035 = vsyncadd (%p2530_p8), [#allocation6], 4294967168 }
 0x3a2 PF: > { %s26_s8 = sadd.s32 1, %s3058_s8   ;;  %s3539_s15 = sld [smem:[#allocation16_spill]] }
 0x3a3   : > { %p23_p6 = scmp.ge.s32.totalorder %s26_s8, 5   ;;  %s3540_s0 = sld [smem:[#allocation15_spill]] }
 0x3a4   : > { %s3541_s26 = smov %s3042_s27  ;;  %s3542_s27 = smov %s3046_s28 }
 0x3a5   : > { %s3544_s29 = smov %s3054_s30  ;;  %25 = sbr.rel (!%p23_p6) target bundleno = 10 (0xa), region = 111 }
 0x3a8   : > { %s3543_s28 = smov %s3539_s15 }
 0x3a9   : > { %s3545_s30 = smov %s3540_s0 }
 0x3ac   :  { %2192 = vsyncpa [#allocation5], 1 }
 0x3ad   :  { %2194 = vsyncpa [#allocation5 + $0x1], 1 }
 0x3ae   :  { %2195 = vsyncpa [#allocation8], 1 }
 0x3af   :  { %2197 = vsyncpa [#allocation8 + $0x1], 1 }
 0x3b0   :  { %2198 = vsyncpa [#allocation6], 1 }
 0x3b1   :  { %2200 = vsyncpa [#allocation6 + $0x1], 1 }

</bundles_post_ra>
